<compile_context>
chip_gen: v6e
topology: v6e:2x2x1
jax: 0.10.0
libtpu: 0.0.40
codegen_flags: <defaults>
</compile_context>

<pallas_src>
import functools
import math

import jax
import jax.numpy as jnp
from jax.experimental import pallas as pl
from jax.experimental.pallas import tpu as pltpu


# ------------------------------ masking (wrapper) ------------------------------

def apply_masking(key, x, mask_token_index):
    """JAX port of geqtrain apply_masking.

    20% of entries are selected; half of those -> mask token (index
    mask_token_index), the other half -> a uniform random token in
    [0, mask_token_index - 1)."""
    k_mask, k_choice, k_tok = jax.random.split(key, 3)
    random_mask = jax.random.uniform(k_mask, x.shape)
    mask = random_mask > 0.8
    random_choice = jax.random.uniform(k_choice, x.shape)
    mask_or_random = random_choice > 0.5
    num_categories = mask_token_index - 1
    random_tokens = jax.random.randint(k_tok, x.shape, 0, num_categories,
                                       dtype=x.dtype)
    x = jnp.where(mask & ~mask_or_random,
                  jnp.asarray(mask_token_index, x.dtype), x)
    x = jnp.where(mask & mask_or_random, random_tokens, x)
    return x


# ------------------------------- Pallas kernel ---------------------------------

def _embedding_attrs_kernel(idx_ref, num_ref, wa_ref, wb_ref, out_ref, *,
                            v_a, v_b, d_a, d_b):
    """One lane-major node tile of EmbeddingAttrs.

    idx_ref : (2, TILE_N)      int32  categorical indices (attr A row 0, attr B row 1)
    num_ref : (D_num, TILE_N)  f32    numerical attributes (pass-through)
    wa_ref  : (d_a, v_a)       f32    embedding table A, feature-major (VMEM-resident)
    wb_ref  : (d_b, v_b)       f32    embedding table B, feature-major (VMEM-resident)
    out_ref : (d_a + d_b + D_num, TILE_N) f32
    """
    idx = idx_ref[...]                              # (2, TILE_N) int32
    tile_n = idx.shape[1]

    # Hoist the (tiny, <=2 vreg) tables once per tile; slice values below.
    wa = wa_ref[...]                                # (d_a, v_a)
    wb = wb_ref[...]                                # (d_b, v_b)

    col_a = idx[0:1, :]                             # (1, TILE_N)
    col_b = idx[1:2, :]                             # (1, TILE_N)

    # Select-chain embedding lookup (vocabularies are tiny, so an unrolled
    # cmp+select per entry on the VPU beats a <1%-utilized one-hot MXU matmul).
    # Start from token 0's embedding; padded/garbage lanes of a partial last
    # tile harmlessly pick token 0 and are discarded by the partial-block store.
    acc_a = jnp.broadcast_to(wa[:, 0:1], (d_a, tile_n))
    for v in range(1, v_a):                         # static unroll
        acc_a = jnp.where(col_a == v, wa[:, v:v + 1], acc_a)

    acc_b = jnp.broadcast_to(wb[:, 0:1], (d_b, tile_n))
    for v in range(1, v_b):                         # static unroll
        acc_b = jnp.where(col_b == v, wb[:, v:v + 1], acc_b)

    nums = num_ref[...].astype(jnp.float32)         # (D_num, TILE_N)

    # torch.cat(out, dim=-1).float(), feature-major: one full-width store of a
    # value assembled in registers (all concat offsets are sublane-aligned:
    # 0, d_a, d_a+d_b are multiples of 8 in the test config; lanes are dense).
    out_ref[...] = jnp.concatenate([acc_a, acc_b, nums], axis=0)


# --------------------------------- wrapper --------------------------------------

def _round_up(x, m):
    return ((x + m - 1) // m) * m


def _pick_tile_n(n, max_tile=4096):
    # Big lane-major tiles (multiples of 128) amortize the ~0.35 us/step grid
    # overhead, while keeping >= 2 grid steps so the "parallel" axis can shard
    # across v7x's two TensorCores.  Double-buffered VMEM need at 4096 lanes is
    # ~1.6 MiB -- far under every generation's budget (64 MiB on v7x).
    half = _round_up(max(1, -(-n // 2)), 128)
    return int(max(128, min(max_tile, half)))


def embedding_attrs_forward(idx_a, idx_b, numerical, w_a, w_b, *,
                            use_masking=False, mask_a=False, mask_b=False,
                            rng_key=None, tile_n=None, feature_major_out=False):
    """Pallas implementation of EmbeddingAttrs.forward (2 categorical + numericals).

    Returns (N, d_a + d_b + d_num) float32 (same contract as the torch module);
    set feature_major_out=True to get the kernel-native (D_out, N) slab instead.
    """
    idx_a = jnp.asarray(idx_a, jnp.int32).reshape(-1)       # (N,)
    idx_b = jnp.asarray(idx_b, jnp.int32).reshape(-1)       # (N,)
    n = idx_a.shape[0]
    numerical = jnp.asarray(numerical, jnp.float32).reshape(n, -1)

    v_a, d_a = w_a.shape
    v_b, d_b = w_b.shape
    d_num = numerical.shape[-1]
    d_out = d_a + d_b + d_num

    # Training-time masking (apply_masking) on the index tensors, same semantics
    # as the torch module: mask_token_index = n_types - 1 (always in-range).
    if use_masking and (mask_a or mask_b):
        if rng_key is None:
            raise ValueError("rng_key is required when masking is enabled")
        key_a, key_b = jax.random.split(rng_key)
        if mask_a:
            idx_a = apply_masking(key_a, idx_a, mask_token_index=v_a - 1)
        if mask_b:
            idx_b = apply_masking(key_b, idx_b, mask_token_index=v_b - 1)

    # Feature-major, lane-dense inputs.
    idx = jnp.stack([idx_a, idx_b], axis=0)                  # (2, N)
    num_t = numerical.T                                      # (d_num, N)
    wa_t = jnp.asarray(w_a, jnp.float32).T                   # (d_a, v_a)
    wb_t = jnp.asarray(w_b, jnp.float32).T                   # (d_b, v_b)

    if tile_n is None:
        tile_n = _pick_tile_n(n)
    grid = (pl.cdiv(n, tile_n),)

    kernel = functools.partial(_embedding_attrs_kernel,
                               v_a=v_a, v_b=v_b, d_a=d_a, d_b=d_b)

    out_fm = pl.pallas_call(
        kernel,
        out_shape=jax.ShapeDtypeStruct((d_out, n), jnp.float32),
        grid=grid,
        in_specs=[
            pl.BlockSpec((2, tile_n), lambda i: (0, i)),        # indices, lane-tiled
            pl.BlockSpec((d_num, tile_n), lambda i: (0, i)),    # numericals, lane-tiled
            pl.BlockSpec((d_a, v_a), lambda i: (0, 0)),         # table A, VMEM-resident
            pl.BlockSpec((d_b, v_b), lambda i: (0, 0)),         # table B, VMEM-resident
        ],
        out_specs=pl.BlockSpec((d_out, tile_n), lambda i: (0, i)),
        compiler_params=pltpu.CompilerParams(
            dimension_semantics=("parallel",),                  # megacore-shardable
            vmem_limit_bytes=32 * 1024 * 1024),                 # safe on v7x (64 MiB part)
    )(idx, num_t, wa_t, wb_t)

    if feature_major_out:
        return out_fm                                           # (d_out, N)
    # Back to the torch contract (N, d_out) float32 (layout plumbing only).
    return out_fm.T


# ------------------------ deterministic parameter init --------------------------

def _xavier_embedding(key, n_types, emb_dim):
    # torch.nn.init.xavier_uniform_ then *= 0.3333 * math.isqrt(embedding_dim)
    # (the torch module really uses math.isqrt, so we match it exactly).
    bound = math.sqrt(6.0 / (n_types + emb_dim))
    w = jax.random.uniform(key, (n_types, emb_dim), jnp.float32, -bound, bound)
    return w * (0.3333 * math.isqrt(emb_dim))


# ----------------------------------- main ----------------------------------------

if __name__ == "__main__":
    key = jax.random.PRNGKey(0)
    k1, k2, k3, k4, k5, k_mask = jax.random.split(key, 6)

    # Module config (synthetic):
    #   "atom_type":    categorical, 5 types,  dim 8   (masked when training)
    #   "residue_type": categorical, 7 types,  dim 16
    #   "charge":       numerical,             dim 4
    #   out_field dim = 8 + 16 + 4 = 28
    N = 2048                       # enough rows to exercise 2 lane-major tiles
    V_A, D_A = 5, 8
    V_B, D_B = 7, 16
    D_NUM = 4

    w_a = _xavier_embedding(k1, V_A, D_A)
    w_b = _xavier_embedding(k2, V_B, D_B)
    idx_a = jax.random.randint(k3, (N, 1), 0, V_A, dtype=jnp.int32)
    idx_b = jax.random.randint(k4, (N, 1), 0, V_B, dtype=jnp.int32)
    numerical = jax.random.normal(k5, (N, D_NUM), dtype=jnp.float32)

    # 1) masking disabled -> deterministic; check against a pure-JAX reference.
    out = embedding_attrs_forward(idx_a, idx_b, numerical, w_a, w_b,
                                  use_masking=False)
    out = jax.block_until_ready(out)
    ref = jnp.concatenate([jnp.take(w_a, idx_a[:, 0], axis=0),
                           jnp.take(w_b, idx_b[:, 0], axis=0),
                           numerical], axis=-1)
    assert out.shape == (N, D_A + D_B + D_NUM)
    assert jnp.allclose(out, ref, atol=1e-6), "mismatch vs reference (no mask)"

    # 2) masking enabled on "atom_type" (use_masking=True, fields_to_mask=["atom_type"]).
    out_masked = embedding_attrs_forward(idx_a, idx_b, numerical, w_a, w_b,
                                         use_masking=True, mask_a=True,
                                         mask_b=False, rng_key=k_mask)
    out_masked = jax.block_until_ready(out_masked)
    # Replicate the wrapper's key split / shapes to verify the masked path exactly.
    key_a_ref, _ = jax.random.split(k_mask)
    idx_a_masked = apply_masking(key_a_ref, idx_a.reshape(-1),
                                 mask_token_index=V_A - 1)
    ref_masked = jnp.concatenate([jnp.take(w_a, idx_a_masked, axis=0),
                                  jnp.take(w_b, idx_b[:, 0], axis=0),
                                  numerical], axis=-1)
    assert out_masked.shape == (N, D_A + D_B + D_NUM)
    assert jnp.allclose(out_masked, ref_masked, atol=1e-6), \
        "mismatch vs reference (masked)"

    # 3) N not a multiple of the 128-lane tile -> exercises the partial last block.
    N2 = 200
    out_small = embedding_attrs_forward(idx_a[:N2], idx_b[:N2], numerical[:N2],
                                        w_a, w_b, use_masking=False)
    out_small = jax.block_until_ready(out_small)
    assert out_small.shape == (N2, D_A + D_B + D_NUM)
    assert jnp.allclose(out_small, ref[:N2], atol=1e-6), \
        "mismatch vs reference (partial tile)"

    print("KERNEL_OK")
</pallas_src>

<mosaic_0001>
module attributes {stable_mosaic.version = 11 : i64} {
  func.func @_embedding_attrs_kernel(%arg0: i32, %arg1: memref<2x1024xi32, #tpu.memory_space<vmem>>, %arg2: memref<4x1024xf32, #tpu.memory_space<vmem>>, %arg3: memref<8x5xf32, #tpu.memory_space<vmem>>, %arg4: memref<16x7xf32, #tpu.memory_space<vmem>>, %arg5: memref<28x1024xf32, #tpu.memory_space<vmem>>) attributes {dimension_semantics = [#tpu.dimension_semantics<parallel>], iteration_bounds = array<i64: 2>, scalar_prefetch = 0 : i64, scratch_operands = 0 : i64, tpu.core_type = #tpu.core_type<tc>, window_params = [{transform_indices = @transform_0, window_bounds = array<i64: 2, 1024>}, {transform_indices = @transform_1, window_bounds = array<i64: 4, 1024>}, {pipeline_mode = #tpu.pipeline_mode<synchronous>, transform_indices = @transform_2, window_bounds = array<i64: 8, 5>}, {pipeline_mode = #tpu.pipeline_mode<synchronous>, transform_indices = @transform_3, window_bounds = array<i64: 16, 7>}, {transform_indices = @transform_4, window_bounds = array<i64: 28, 1024>}]} {
    %c0 = arith.constant 0 : index
    %c0_0 = arith.constant 0 : index
    %0 = vector.load %arg1[%c0, %c0_0] : memref<2x1024xi32, #tpu.memory_space<vmem>>, vector<2x1024xi32>
    %c0_1 = arith.constant 0 : index
    %c0_2 = arith.constant 0 : index
    %1 = vector.load %arg3[%c0_1, %c0_2] : memref<8x5xf32, #tpu.memory_space<vmem>>, vector<8x5xf32>
    %c0_3 = arith.constant 0 : index
    %c0_4 = arith.constant 0 : index
    %2 = vector.load %arg4[%c0_3, %c0_4] : memref<16x7xf32, #tpu.memory_space<vmem>>, vector<16x7xf32>
    %3 = vector.extract_strided_slice %0 {offsets = [0, 0], sizes = [1, 1024], strides = [1, 1]} : vector<2x1024xi32> to vector<1x1024xi32>
    %4 = vector.extract_strided_slice %0 {offsets = [1, 0], sizes = [1, 1024], strides = [1, 1]} : vector<2x1024xi32> to vector<1x1024xi32>
    %5 = vector.extract_strided_slice %1 {offsets = [0, 0], sizes = [8, 1], strides = [1, 1]} : vector<8x5xf32> to vector<8x1xf32>
    %6 = vector.shape_cast %5 : vector<8x1xf32> to vector<8x1xf32>
    %7 = vector.broadcast %6 : vector<8x1xf32> to vector<8x1024xf32>
    %c1_i32 = arith.constant 1 : i32
    %8 = vector.broadcast %c1_i32 : i32 to vector<1x1024xi32>
    %9 = arith.cmpi eq, %3, %8 : vector<1x1024xi32>
    %10 = vector.extract_strided_slice %1 {offsets = [0, 1], sizes = [8, 1], strides = [1, 1]} : vector<8x5xf32> to vector<8x1xf32>
    %11 = vector.shape_cast %9 : vector<1x1024xi1> to vector<1x1024xi1>
    %12 = vector.broadcast %11 : vector<1x1024xi1> to vector<8x1024xi1>
    %13 = vector.shape_cast %10 : vector<8x1xf32> to vector<8x1xf32>
    %14 = vector.broadcast %13 : vector<8x1xf32> to vector<8x1024xf32>
    %15 = arith.select %12, %14, %7 : vector<8x1024xi1>, vector<8x1024xf32>
    %c2_i32 = arith.constant 2 : i32
    %16 = vector.broadcast %c2_i32 : i32 to vector<1x1024xi32>
    %17 = arith.cmpi eq, %3, %16 : vector<1x1024xi32>
    %18 = vector.extract_strided_slice %1 {offsets = [0, 2], sizes = [8, 1], strides = [1, 1]} : vector<8x5xf32> to vector<8x1xf32>
    %19 = vector.shape_cast %17 : vector<1x1024xi1> to vector<1x1024xi1>
    %20 = vector.broadcast %19 : vector<1x1024xi1> to vector<8x1024xi1>
    %21 = vector.shape_cast %18 : vector<8x1xf32> to vector<8x1xf32>
    %22 = vector.broadcast %21 : vector<8x1xf32> to vector<8x1024xf32>
    %23 = arith.select %20, %22, %15 : vector<8x1024xi1>, vector<8x1024xf32>
    %c3_i32 = arith.constant 3 : i32
    %24 = vector.broadcast %c3_i32 : i32 to vector<1x1024xi32>
    %25 = arith.cmpi eq, %3, %24 : vector<1x1024xi32>
    %26 = vector.extract_strided_slice %1 {offsets = [0, 3], sizes = [8, 1], strides = [1, 1]} : vector<8x5xf32> to vector<8x1xf32>
    %27 = vector.shape_cast %25 : vector<1x1024xi1> to vector<1x1024xi1>
    %28 = vector.broadcast %27 : vector<1x1024xi1> to vector<8x1024xi1>
    %29 = vector.shape_cast %26 : vector<8x1xf32> to vector<8x1xf32>
    %30 = vector.broadcast %29 : vector<8x1xf32> to vector<8x1024xf32>
    %31 = arith.select %28, %30, %23 : vector<8x1024xi1>, vector<8x1024xf32>
    %c4_i32 = arith.constant 4 : i32
    %32 = vector.broadcast %c4_i32 : i32 to vector<1x1024xi32>
    %33 = arith.cmpi eq, %3, %32 : vector<1x1024xi32>
    %34 = vector.extract_strided_slice %1 {offsets = [0, 4], sizes = [8, 1], strides = [1, 1]} : vector<8x5xf32> to vector<8x1xf32>
    %35 = vector.shape_cast %33 : vector<1x1024xi1> to vector<1x1024xi1>
    %36 = vector.broadcast %35 : vector<1x1024xi1> to vector<8x1024xi1>
    %37 = vector.shape_cast %34 : vector<8x1xf32> to vector<8x1xf32>
    %38 = vector.broadcast %37 : vector<8x1xf32> to vector<8x1024xf32>
    %39 = arith.select %36, %38, %31 : vector<8x1024xi1>, vector<8x1024xf32>
    %40 = vector.extract_strided_slice %2 {offsets = [0, 0], sizes = [16, 1], strides = [1, 1]} : vector<16x7xf32> to vector<16x1xf32>
    %41 = vector.shape_cast %40 : vector<16x1xf32> to vector<16x1xf32>
    %42 = vector.broadcast %41 : vector<16x1xf32> to vector<16x1024xf32>
    %c1_i32_5 = arith.constant 1 : i32
    %43 = vector.broadcast %c1_i32_5 : i32 to vector<1x1024xi32>
    %44 = arith.cmpi eq, %4, %43 : vector<1x1024xi32>
    %45 = vector.extract_strided_slice %2 {offsets = [0, 1], sizes = [16, 1], strides = [1, 1]} : vector<16x7xf32> to vector<16x1xf32>
    %46 = vector.shape_cast %44 : vector<1x1024xi1> to vector<1x1024xi1>
    %47 = vector.broadcast %46 : vector<1x1024xi1> to vector<16x1024xi1>
    %48 = vector.shape_cast %45 : vector<16x1xf32> to vector<16x1xf32>
    %49 = vector.broadcast %48 : vector<16x1xf32> to vector<16x1024xf32>
    %50 = arith.select %47, %49, %42 : vector<16x1024xi1>, vector<16x1024xf32>
    %c2_i32_6 = arith.constant 2 : i32
    %51 = vector.broadcast %c2_i32_6 : i32 to vector<1x1024xi32>
    %52 = arith.cmpi eq, %4, %51 : vector<1x1024xi32>
    %53 = vector.extract_strided_slice %2 {offsets = [0, 2], sizes = [16, 1], strides = [1, 1]} : vector<16x7xf32> to vector<16x1xf32>
    %54 = vector.shape_cast %52 : vector<1x1024xi1> to vector<1x1024xi1>
    %55 = vector.broadcast %54 : vector<1x1024xi1> to vector<16x1024xi1>
    %56 = vector.shape_cast %53 : vector<16x1xf32> to vector<16x1xf32>
    %57 = vector.broadcast %56 : vector<16x1xf32> to vector<16x1024xf32>
    %58 = arith.select %55, %57, %50 : vector<16x1024xi1>, vector<16x1024xf32>
    %c3_i32_7 = arith.constant 3 : i32
    %59 = vector.broadcast %c3_i32_7 : i32 to vector<1x1024xi32>
    %60 = arith.cmpi eq, %4, %59 : vector<1x1024xi32>
    %61 = vector.extract_strided_slice %2 {offsets = [0, 3], sizes = [16, 1], strides = [1, 1]} : vector<16x7xf32> to vector<16x1xf32>
    %62 = vector.shape_cast %60 : vector<1x1024xi1> to vector<1x1024xi1>
    %63 = vector.broadcast %62 : vector<1x1024xi1> to vector<16x1024xi1>
    %64 = vector.shape_cast %61 : vector<16x1xf32> to vector<16x1xf32>
    %65 = vector.broadcast %64 : vector<16x1xf32> to vector<16x1024xf32>
    %66 = arith.select %63, %65, %58 : vector<16x1024xi1>, vector<16x1024xf32>
    %c4_i32_8 = arith.constant 4 : i32
    %67 = vector.broadcast %c4_i32_8 : i32 to vector<1x1024xi32>
    %68 = arith.cmpi eq, %4, %67 : vector<1x1024xi32>
    %69 = vector.extract_strided_slice %2 {offsets = [0, 4], sizes = [16, 1], strides = [1, 1]} : vector<16x7xf32> to vector<16x1xf32>
    %70 = vector.shape_cast %68 : vector<1x1024xi1> to vector<1x1024xi1>
    %71 = vector.broadcast %70 : vector<1x1024xi1> to vector<16x1024xi1>
    %72 = vector.shape_cast %69 : vector<16x1xf32> to vector<16x1xf32>
    %73 = vector.broadcast %72 : vector<16x1xf32> to vector<16x1024xf32>
    %74 = arith.select %71, %73, %66 : vector<16x1024xi1>, vector<16x1024xf32>
    %c5_i32 = arith.constant 5 : i32
    %75 = vector.broadcast %c5_i32 : i32 to vector<1x1024xi32>
    %76 = arith.cmpi eq, %4, %75 : vector<1x1024xi32>
    %77 = vector.extract_strided_slice %2 {offsets = [0, 5], sizes = [16, 1], strides = [1, 1]} : vector<16x7xf32> to vector<16x1xf32>
    %78 = vector.shape_cast %76 : vector<1x1024xi1> to vector<1x1024xi1>
    %79 = vector.broadcast %78 : vector<1x1024xi1> to vector<16x1024xi1>
    %80 = vector.shape_cast %77 : vector<16x1xf32> to vector<16x1xf32>
    %81 = vector.broadcast %80 : vector<16x1xf32> to vector<16x1024xf32>
    %82 = arith.select %79, %81, %74 : vector<16x1024xi1>, vector<16x1024xf32>
    %c6_i32 = arith.constant 6 : i32
    %83 = vector.broadcast %c6_i32 : i32 to vector<1x1024xi32>
    %84 = arith.cmpi eq, %4, %83 : vector<1x1024xi32>
    %85 = vector.extract_strided_slice %2 {offsets = [0, 6], sizes = [16, 1], strides = [1, 1]} : vector<16x7xf32> to vector<16x1xf32>
    %86 = vector.shape_cast %84 : vector<1x1024xi1> to vector<1x1024xi1>
    %87 = vector.broadcast %86 : vector<1x1024xi1> to vector<16x1024xi1>
    %88 = vector.shape_cast %85 : vector<16x1xf32> to vector<16x1xf32>
    %89 = vector.broadcast %88 : vector<16x1xf32> to vector<16x1024xf32>
    %90 = arith.select %87, %89, %82 : vector<16x1024xi1>, vector<16x1024xf32>
    %c0_9 = arith.constant 0 : index
    %c0_10 = arith.constant 0 : index
    %91 = vector.load %arg2[%c0_9, %c0_10] : memref<4x1024xf32, #tpu.memory_space<vmem>>, vector<4x1024xf32>
    %92 = tpu.concatenate %39, %90, %91 in 0 : vector<8x1024xf32>, vector<16x1024xf32>, vector<4x1024xf32> -> vector<28x1024xf32>
    %c0_11 = arith.constant 0 : index
    %c0_12 = arith.constant 0 : index
    %93 = vector.load %arg5[%c0_11, %c0_12] : memref<28x1024xf32, #tpu.memory_space<vmem>>, vector<28x1024xf32>
    tpu.vector_store %arg5[%c0_11, %c0_12], %92 {strides = array<i32>} : memref<28x1024xf32, #tpu.memory_space<vmem>>, vector<28x1024xf32>,
    return
  }
  func.func @transform_0(%arg0: i32) -> (i32, i32) {
    %c0_i32 = arith.constant 0 : i32
    %c0_i32_0 = arith.constant 0 : i32
    return %c0_i32, %arg0 : i32, i32
  }
  func.func @transform_1(%arg0: i32) -> (i32, i32) {
    %c0_i32 = arith.constant 0 : i32
    %c0_i32_0 = arith.constant 0 : i32
    return %c0_i32, %arg0 : i32, i32
  }
  func.func @transform_2(%arg0: i32) -> (i32, i32) {
    %c0_i32 = arith.constant 0 : i32
    %c0_i32_0 = arith.constant 0 : i32
    %c0_i32_1 = arith.constant 0 : i32
    return %c0_i32, %c0_i32_0 : i32, i32
  }
  func.func @transform_3(%arg0: i32) -> (i32, i32) {
    %c0_i32 = arith.constant 0 : i32
    %c0_i32_0 = arith.constant 0 : i32
    %c0_i32_1 = arith.constant 0 : i32
    return %c0_i32, %c0_i32_0 : i32, i32
  }
  func.func @transform_4(%arg0: i32) -> (i32, i32) {
    %c0_i32 = arith.constant 0 : i32
    %c0_i32_0 = arith.constant 0 : i32
    return %c0_i32, %arg0 : i32, i32
  }
}

</mosaic_0001>

<bundles_post_ra>
// kernel: tpu_custom_call.1
= control target key start
LH: loop header
LB: loop body
LE: loop exit
PB: predicated region body
PF: predicated region fallthrough
CT: control target
= control target key end

     0   :  { %9 = vsyncpa [#allocation3], 0  ;;  %s2818_s0 = inlined_call_operand.hbm [shape: s32[2,2048], index: 0, kind: input, shape index: {}]   ;;  %s2819_s1 = inlined_call_operand.hbm [shape: f32[4,2048], index: 1, kind: input, shape index: {}]   ;;  %s2820_s2 = inlined_call_operand.vmem [shape: f32[8,5], index: 2, kind: input, shape index: {}]   ;;  %s2821_s3 = inlined_call_operand.vmem [shape: f32[16,7], index: 3, kind: input, shape index: {}]   ;;  %s2822_s4 = inlined_call_operand.hbm [shape: f32[28,2048], index: 4, kind: output, shape index: {}]  }
   0x1   :  { %11 = vsyncpa [#allocation3 + $0x1], 0 }
   0x2   :  { %12 = vsyncpa [#allocation6], 0 }
   0x3   :  { %14 = vsyncpa [#allocation6 + $0x1], 0 }
   0x4   :  { %15 = vsyncpa [#allocation4], 0 }
   0x5   :  { %17 = vsyncpa [#allocation4 + $0x1], 0  ;;  %s1634_s15 = smov 0   ;;  %s1636_s16 = smov 0  }
   0x6   :  { %s1638_s17 = smov 0   ;;  %s1640_s18 = smov 0  }
   0x7 LB: > { %s1655_s19 = sadd.s32 4294967295, %s1594_s18   ;;  %s1369_s20 = sadd.s32 4294967294, %s1594_s18   ;;  %s1594_s18 = sphi %s1640_s18, %s3113_s18   ;;  %s1590_s17 = sphi %s1638_s17, %s3112_s17   ;;  %s1586_s16 = sphi %s1636_s16, %s3111_s16   ;;  %s1582_s15 = sphi %s1634_s15, %s3110_s15  }
   0x8   : > { %s1659_s21 = sadd.s32 1, %s1594_s18   ;;  %s30_s22 = sadd.s32 1, %s1590_s17 }
   0x9   : > { %s27_s23 = ssub.s32 %s1594_s18, %s1659_s21  ;;  %p37_p0 = scmp.ne.s32.totalorder %s1590_s17, %s1586_s16 }
   0xa   : > { %p28_p1 = scmp.eq.s32.totalorder %s27_s23, 0  ;;  %p38_p2 = scmp.eq.s32.totalorder %s1594_s18, 0 }
   0xb   : > { %p43_p3 = scmp.ne.s32.totalorder %s1586_s16, %s1582_s15  ;;  %p44_p4 = scmp.eq.s32.totalorder %s1655_s19, 0 }
   0xc   : > { %s1671_s24 = scalar_select %p28_p1, %s1590_s17, %s30_s22  }
   0xd   : > { %p1673_p5 = por %p38_p2, %p37_p0  ;;  %p1677_p6 = por %p44_p4, %p43_p3 }
   0xe   : > { %p135_p7 = scmp.eq.s32.totalorder %s1655_s19, 1  ;;  %p141_p8 = scmp.eq.s32.totalorder %s1369_s20, 1 }
   0xf   : > { %s2882_s26 = scalar_select %p1677_p6, 1, 0 }
  0x10   : > { %p1407_p10 = scmp.lt.s32.totalorder %s1594_s18, 2  ;;  %p1684_p11 = por %p135_p7, %p37_p0 }
  0x11   : > { %p1688_p12 = por %p141_p8, %p43_p3  ;;  %s1693_s29 = sand.u32 1, %s1590_s17  }
  0x12   : > { %s2883_s27 = scalar_select %p1684_p11, 1, 0 }
  0x13   : > { %s2884_s28 = scalar_select %p1688_p12, 1, 0 }
  0x14   : > { %s1387_s30 = sshll.u32 %s1594_s18, 8  ;;  %s1372_s5 = sshll.u32 %s1693_s29, 4 }
  0x15   : > { %s1700_s8 = scalar_lea.hbm %s2818_s0, %s1387_s30  ;;  %s171_s9 = scalar_lea.vmem [#allocation2], %s1372_s5 }
  0x16   : > { %s179_s10 = sshll.u32 %s171_s9, 4  ;;  %p1704_p13 = pnand %p1407_p10, %p1673_p5  ;;  %s1708_s10 = int_to_ptr.vmem [resolvable:$true] %s179_s10 }
  0x17   : > { %s168_s12 = scalar_lea.sflag [#allocation3], %s1693_s29  ;;  %s1470_s13 = scalar_lea.hbm %s1700_s8, 256 }
  0x18   : > { %p1471_p2 = scmp.ne.s32.totalorder %s1700_s8, %s1470_s13  ;;  %p1472_p3 = pneg %p1704_p13 }
  0x19   : > { %s1475_s22 = scalar_lea.hbm %s2818_s0, 512  ;;  %p1476_p5 = scmp.lt.s32.totalorder %s1700_s8, %s2818_s0 }
  0x1a   : > { %p1473_p4 = pnand %p1472_p3, %p1471_p2  ;;  %p1477_p8 = scmp.lt.s32.totalorder %s1475_s22, %s1470_s13 }
  0x1c   : > { %p1474_p7 = pneg %p1473_p4  ;;  %p1478_p10 = por %p1477_p8, %p1476_p5 }
  0x1e   : > { %p1479_p9 = pnand %p1478_p10, %p1474_p7 }
  0x20   : > { %1482 = shalt.err (!%p1479_p9)
}
  0x21   : > { %s1483_s30 = scalar_lea.vmem %s1708_s10, 256  ;;  %s1596_s5 = smov [#allocation2]  }
  0x22   : > { %p1484_p0 = scmp.ne.s32.totalorder %s1708_s10, %s1483_s30  ;;  %s1488_s6 = sshll.u32 %s1596_s5, 4  ;;  %s1489_s6 = int_to_ptr.vmem [resolvable:$false] %s1488_s6 }
  0x23   : > { %s1490_s7 = scalar_lea.vmem %s1489_s6, 512  ;;  %p1491_p1 = scmp.lt.s32.totalorder %s1708_s10, %s1489_s6 }
  0x24   : > { %p1486_p2 = pnand %p1484_p0, %p1472_p3  ;;  %p1492_p12 = scmp.lt.s32.totalorder %s1490_s7, %s1483_s30 }
  0x26   : > { %p1487_p4 = pneg %p1486_p2  ;;  %p1493_p11 = por %p1492_p12, %p1491_p1 }
  0x28   : > { %p1494_p5 = pnand %p1493_p11, %p1487_p4 }
  0x2a   : > { %1497 = shalt.err (!%p1494_p5)
}
  0x2b   : > { %1399 = dma.hbm_to_vmem [thread:$0]  (!%p1704_p13), %s1700_s8, 256, %s1708_s10, %s168_s12  }
  0x2c   : > { %p2886_p9 = scmp.lt.s32.totalorder %s1594_s18, 3  ;;  %p2887_p0 = scmp.ge.s32.totalorder %s1594_s18, 1 }
  0x2d   : > { %s1375_s13 = sshll.u32 %s1693_s29, 5  ;;  %s1388_s14 = sshll.u32 %s1594_s18, 9 }
  0x2e   : > { %p1741_p7 = pnand %p2887_p0, %p2886_p9  ;;  %s1750_s23 = scalar_lea.hbm %s2819_s1, %s1388_s14 }
  0x2f   : > { %s190_s25 = scalar_lea.vmem [#allocation5], %s1375_s13  ;;  %s187_s8 = scalar_lea.sflag [#allocation6], %s1693_s29 }
  0x30   : > { %s2888_s9 = scalar_select %p1741_p7, 1, 0 }
  0x31   : > { %s198_s30 = sshll.u32 %s190_s25, 4  ;;  %s1498_s10 = scalar_lea.hbm %s1750_s23, 512  ;;  %s199_s30 = int_to_ptr.vmem [resolvable:$true] %s198_s30 }
  0x32   : > { %p1499_p11 = scmp.ne.s32.totalorder %s1750_s23, %s1498_s10  ;;  %s1503_s6 = scalar_lea.hbm %s2819_s1, 1024 }
  0x33   : > { %p1504_p8 = scmp.lt.s32.totalorder %s1750_s23, %s2819_s1  ;;  %p1505_p10 = scmp.lt.s32.totalorder %s1503_s6, %s1498_s10 }
  0x34   : > { %p1501_p12 = pnand %p1499_p11, %p1472_p3 }
  0x35   : > { %p1506_p2 = por %p1505_p10, %p1504_p8 }
  0x36   : > { %p1502_p1 = pneg %p1501_p12 }
  0x38   : > { %p1507_p4 = pnand %p1506_p2, %p1502_p1 }
  0x3a   : > { %1510 = shalt.err (!%p1507_p4)
}
  0x3b   : > { %s1511_s13 = scalar_lea.vmem %s199_s30, 512  ;;  %s1597_s29 = smov [#allocation5]  }
  0x3c   : > { %p1512_p5 = scmp.ne.s32.totalorder %s199_s30, %s1511_s13  ;;  %s1516_s20 = sshll.u32 %s1597_s29, 4  ;;  %s1517_s20 = int_to_ptr.vmem [resolvable:$false] %s1516_s20 }
  0x3d   : > { %s1518_s22 = scalar_lea.vmem %s1517_s20, 1024  ;;  %p1519_p11 = scmp.lt.s32.totalorder %s199_s30, %s1517_s20 }
  0x3e   : > { %p1514_p9 = pnand %p1512_p5, %p1472_p3  ;;  %p1520_p12 = scmp.lt.s32.totalorder %s1518_s22, %s1511_s13 }
  0x40   : > { %p1515_p0 = pneg %p1514_p9  ;;  %p1521_p6 = por %p1520_p12, %p1519_p11 }
  0x42   : > { %p1522_p7 = pnand %p1521_p6, %p1515_p0 }
  0x44   : > { %1525 = shalt.err (!%p1522_p7)
}
  0x45   : > { %1402 = dma.hbm_to_vmem [thread:$0]  (!%p1704_p13), %s1750_s23, 512, %s199_s30, %s187_s8  }
  0x46   : > { %p2889_p1 = scmp.ne.s32.totalorder %s2888_s9, 0 }
  0x48   : > { %207 = sbr.rel (%p2889_p1) target bundleno = 293 (0x125), region = 36 }
  0x4d   : > { %s1774_s25 = sand.u32 1, %s1586_s16   ;;  %p2890_p3 = scmp.ne.s32.totalorder %s2882_s26, 0 }
  0x4e   : > { %s1379_s10 = sshll.u32 %s1774_s25, 4  ;;  %s210_s12 = scalar_lea.sflag [#allocation3], %s1774_s25 }
  0x4f   : > { %s1778_s5 = scalar_lea.vmem [#allocation2], %s1379_s10 }
  0x50   : > { %1569 = dma.done.wait (%p2890_p3), %s210_s12, 256  }
  0x51   : > { %1571 = vsyncadd (%p2890_p3), %s210_s12, 4294967040  ;;  %s1380_s11 = sshll.u32 %s1774_s25, 5  ;;  %s219_s9 = scalar_lea.sflag [#allocation6], %s1774_s25 }
  0x52   : > { %s1786_s23 = scalar_lea.vmem [#allocation5], %s1380_s11 }
  0x53   : > { %1573 = dma.done.wait (%p2890_p3), %s219_s9, 512  }
  0x54   : > { %1575 = vsyncadd (%p2890_p3), %s219_s9, 4294966784  ;;  %v2825_v0 = vmov 0   ;;  %v258_v1 = vld [vmem:[%s2821_s3] sm:$0xff]  ;;  %v259_v3 = vld [vmem:[%s2821_s3 + $0x8] sm:$0xff]  ;;  %v1599_v4 = vmov 1   ;;  %v1600_v5 = vmov 2   ;;  %v269_v18 = vlaneseq }
  0x55   : > { %1453 = vset.pattern.permute.xlu1 %v2825_v0  ;;  %1451 = vset.pattern.permute.xlu0 %v2825_v0  ;;  %v257_v2 = vld [vmem:[%s2820_s2] sm:$0xff]  ;;  %v1601_v6 = vmov 3   ;;  %v1602_v7 = vmov 4   ;;  %v1603_v8 = vmov 5   ;;  %v1604_v9 = vmov 6   ;;  %s1381_s26 = sshll.u32 %s1774_s25, 8 }
  0x56   : > { %619 = vperm.xlu1 %1453, %v258_v1   ;;  %262 = vperm.xlu0 %1451, %v257_v2   ;;  %v1211_v10 = vld [vmem:[%s1786_s23] sm:$0xff]  ;;  %v1212_v11 = vld [vmem:[%s1786_s23 + $0x8] sm:$0xff]  ;;  %v1213_v12 = vld [vmem:[%s1786_s23 + $0x10] sm:$0xff]  ;;  %s1808_s29 = scalar_lea.vmem [#allocation7], %s1381_s26  ;;  %v270_v20 = vshrl.u32 %v269_v18, 7  ;;  %s1389_s20 = sshll.u32 %s1655_s19, 10 }
  0x57   : > { %v1214_v13 = vld [vmem:[%s1786_s23 + $0x18] sm:$0xff]  ;;  %1251 = vst [vmem:[%s1808_s29 + $0xc0] sm:$0xf] %v1211_v10  ;;  %1253 = vst [vmem:[%s1808_s29 + $0xd0] sm:$0xf] %v1212_v11  ;;  %v1219_v14 = vcombine.high %v1211_v10, %v1211_v10  ;;  %v1220_v15 = vcombine.high %v1212_v11, %v1212_v11  ;;  %v1221_v16 = vcombine.high %v1213_v12, %v1213_v12  ;;  %v1819_v19 = vld [vmem:[%s1778_s5] sm:$0xff]  ;;  %s2741_s12 = scalar_lea.hbm %s2822_s4, %s1389_s20 }
  0x58   : > { %1255 = vst [vmem:[%s1808_s29 + $0xe0] sm:$0xf] %v1213_v12  ;;  %1257 = vst [vmem:[%s1808_s29 + $0xf0] sm:$0xf] %v1214_v13  ;;  %v1222_v17 = vcombine.high %v1214_v13, %v1214_v13  ;;  %v1822_v21 = vld [vmem:[%s1778_s5 + $0x8] sm:$0xff]  ;;  %v1824_v22 = vsub.s32 0, %v270_v20 }
  0x59   : > { %1252 = vst [vmem:[%s1808_s29 + $0xc8] sm:$0xf] %v1219_v14  ;;  %1254 = vst [vmem:[%s1808_s29 + $0xd8] sm:$0xf] %v1220_v15  ;;  %v1826_v23 = vsub.s32 2, %v270_v20  ;;  %vm265_vm0 = vcmp.eq.s32.totalorder %v1819_v19, 1 }
  0x5a   : > { %624 = vperm.xlu1 %1453, %v259_v3   ;;  %1452 = vset.pattern.permute.xlu0 %v1599_v4  ;;  %1256 = vst [vmem:[%s1808_s29 + $0xe8] sm:$0xf] %v1221_v16  ;;  %1258 = vst [vmem:[%s1808_s29 + $0xf8] sm:$0xf] %v1222_v17  ;;  %v1829_v24 = vsub.s32 4, %v270_v20  ;;  %v1831_v25 = vsub.s32 6, %v270_v20 }
  0x5b   : > { %342 = vperm.xlu0 %1452, %v257_v2   ;;  %vm266_vm1 = vcmp.eq.s32.totalorder %v1822_v21, 1  ;;  %v267_v26 = vsel %vm265_vm0, 1, %v2825_v0  ;;  %v1835_v27 = vsub.s32 1, %v270_v20  ;;  %v1839_v30 = vsub.s32 3, %v270_v20  ;;  %s1273_s22 = sshll.u32 %s1808_s29, 4  ;;  %s1260_s5 = scalar_lea.sflag [#allocation4], %s1774_s25  ;;  %s2751_s22 = int_to_ptr.vmem [resolvable:$true] %s1273_s22 }
  0x5c   : > { %v272_v28 = vrot.slane %v267_v26, %v1824_v22  ;;  %v276_v29 = vrot.slane %v267_v26, %v1826_v23  ;;  %v268_v31 = vsel %vm266_vm1, 1, %v2825_v0  ;;  %v280_v32 = vrot.slane %v267_v26, %v1829_v24  ;;  %s1526_s11 = scalar_lea.vmem %s2751_s22, 4096  ;;  %p3107_p13 = scmp.ne.s32.totalorder %s2883_s27, 0 }
  0x5d   : > { %v1843_v33 = vsub.s32 5, %v270_v20  ;;  %v1845_v34 = vsub.s32 7, %v270_v20  ;;  %v284_v35 = vrot.slane %v267_v26, %v1831_v25  ;;  %v288_v36 = vrot.slane %v268_v31, %v1824_v22  ;;  %p1527_p6 = scmp.ne.s32.totalorder %s2751_s22, %s1526_s11  ;;  %s1605_s9 = smov [#allocation7]  }
  0x5e   : > { %1454 = vset.pattern.permute.xlu1 %v1599_v4  ;;  %v292_v37 = vrot.slane %v268_v31, %v1826_v23  ;;  %v296_v38 = vrot.slane %v268_v31, %v1829_v24  ;;  %v300_v39 = vrot.slane %v268_v31, %v1831_v25  ;;  %v1853_v40 = vrot.slane %v272_v28, %v1824_v22  ;;  %s1530_s23 = sshll.u32 %s1605_s9, 4  ;;  %s1531_s23 = int_to_ptr.vmem [resolvable:$false] %s1530_s23 }
  0x5f   : > { %700 = vperm.xlu1 %1454, %v258_v1   ;;  %704 = vperm.xlu0 %1452, %v259_v3   ;;  %v1856_v41 = vrot.slane %v276_v29, %v1824_v22  ;;  %v630_v42 = vrot.slane %v267_v26, %v1835_v27  ;;  %vm353_vm2 = vcmp.eq.s32.totalorder %v1819_v19, 2  ;;  %v1861_v43 = vrot.slane %v280_v32, %v1824_v22  ;;  %p1528_p7 = pnand %p1527_p6, %p3107_p13  ;;  %s1532_s30 = scalar_lea.vmem %s1531_s23, 8192 }
  0x60   : > { %v634_v44 = vrot.slane %v267_v26, %v1839_v30  ;;  %v638_v45 = vrot.slane %v267_v26, %v1843_v33  ;;  %v642_v46 = vrot.slane %v267_v26, %v1845_v34  ;;  %v1867_v47 = vrot.slane %v284_v35, %v1824_v22  ;;  %p1533_p10 = scmp.lt.s32.totalorder %s2751_s22, %s1531_s23  ;;  %p1534_p2 = scmp.lt.s32.totalorder %s1532_s30, %s1526_s11 }
  0x61   : > { %v1870_v48 = vrot.slane %v288_v36, %v1824_v22  ;;  %v646_v49 = vrot.slane %v268_v31, %v1835_v27  ;;  %vm354_vm3 = vcmp.eq.s32.totalorder %v1822_v21, 2  ;;  %v1875_v50 = vrot.slane %v292_v37, %v1824_v22  ;;  %p1529_p8 = pneg %p1528_p7 }
  0x62   : > { %v650_v51 = vrot.slane %v268_v31, %v1839_v30  ;;  %v654_v52 = vrot.slane %v268_v31, %v1843_v33  ;;  %v355_v53 = vsel %vm353_vm2, 1, %v2825_v0  ;;  %v1881_v54 = vrot.slane %v296_v38, %v1824_v22  ;;  %p1535_p4 = por %p1534_p2, %p1533_p10 }
  0x63   : > { %1455 = vset.pattern.permute.xlu1 %v1600_v5  ;;  %1456 = vset.pattern.permute.xlu0 %v1600_v5  ;;  %v1884_v55 = vrot.slane %v300_v39, %v1824_v22  ;;  %v658_v56 = vrot.slane %v268_v31, %v1845_v34  ;;  %v1888_v57 = vrot.slane %v630_v42, %v1835_v27  ;;  %v356_v61 = vsel %vm354_vm3, 1, %v2825_v0 }
  0x64   : > { %796 = vperm.xlu1 %1455, %v258_v1   ;;  %800 = vperm.xlu0 %1456, %v259_v3   ;;  %v1891_v58 = vrot.slane %v634_v44, %v1835_v27  ;;  %v1894_v59 = vrot.slane %v638_v45, %v1835_v27  ;;  %v1897_v60 = vrot.slane %v642_v46, %v1835_v27  ;;  %vm441_vm4 = vcmp.eq.s32.totalorder %v1819_v19, 3  ;;  %p1536_p5 = pnand %p1535_p4, %p1529_p8 }
  0x65   : > { %v1901_v62 = vrot.slane %v646_v49, %v1835_v27  ;;  %v726_v63 = vrot.slane %v355_v53, %v1835_v27  ;;  %vm442_vm5 = vcmp.eq.s32.totalorder %v1822_v21, 3  ;;  %v734_v4 = vrot.slane %v355_v53, %v1843_v33 }
  0x66   : > { %v738_v5 = vrot.slane %v355_v53, %v1845_v34  ;;  %v754_v10 = vrot.slane %v356_v61, %v1845_v34  ;;  %v1923_v11 = vsel %vm441_vm4, 1, %v2825_v0  ;;  %v1926_v12 = vsel %vm442_vm5, 1, %v2825_v0 }
  0x67   : > { %v1929_v13 = vrot.slane %v726_v63, %v1835_v27  ;;  %v360_v14 = vrot.slane %v355_v53, %v1824_v22  ;;  %v364_v15 = vrot.slane %v355_v53, %v1826_v23  ;;  %v368_v16 = vrot.slane %v355_v53, %v1829_v24 }
  0x68   : > { %1457 = vset.pattern.permute.xlu1 %v1601_v6  ;;  %430 = vperm.xlu0 %1456, %v257_v2   ;;  %v1938_v18 = vrot.slane %v734_v4, %v1835_v27  ;;  %v372_v20 = vrot.slane %v355_v53, %v1831_v25  ;;  %v376_v26 = vrot.slane %v356_v61, %v1824_v22  ;;  %vm529_vm6 = vcmp.eq.s32.totalorder %v1819_v19, 4 }
  0x69   : > { %892 = vperm.xlu1 %1457, %v258_v1   ;;  %v1943_v28 = vrot.slane %v738_v5, %v1835_v27  ;;  %v380_v35 = vrot.slane %v356_v61, %v1826_v23  ;;  %v384_v36 = vrot.slane %v356_v61, %v1829_v24  ;;  %v388_v37 = vrot.slane %v356_v61, %v1831_v25 }
  0x6a   : > { %v1959_v38 = vrot.slane %v754_v10, %v1835_v27  ;;  %v1962_v39 = vrot.slane %v360_v14, %v1824_v22  ;;  %v1965_v42 = vrot.slane %v364_v15, %v1824_v22  ;;  %v1968_v44 = vrot.slane %v368_v16, %v1824_v22 }
  0x6b   : > { %2891 = vst [vmem:[#allocation11_spill] sm:$0xff] %v1943_v28  ;;  %v1971_v45 = vrot.slane %v372_v20, %v1824_v22  ;;  %v1974_v46 = vrot.slane %v376_v26, %v1824_v22  ;;  %v822_v49 = vrot.slane %v1923_v11, %v1835_v27  ;;  %vm530_vm7 = vcmp.eq.s32.totalorder %v1822_v21, 4 }
  0x6c   : > { %1459 = vset.pattern.permute.xlu0 %v1602_v7  ;;  %2892 = vst [vmem:[#allocation12_spill] sm:$0xff] %v1959_v38  ;;  %v1992_v63 = vrot.slane %v384_v36, %v1824_v22  ;;  %v838_v4 = vrot.slane %v1926_v12, %v1835_v27  ;;  %v842_v5 = vrot.slane %v1926_v12, %v1839_v30  ;;  %vm1011_vm8 = vcmp.eq.s32.totalorder %v1819_v19, 5 }
  0x6d   : > { %896 = vperm.xlu1 %1457, %v259_v3   ;;  %992 = vperm.xlu0 %1459, %v259_v3   ;;  %2893 = vst [vmem:[#allocation13_spill] sm:$0xff] %v1974_v46  ;;  %v2009_v10 = vrot.slane %v822_v49, %v1835_v27  ;;  %vm1012_vm9 = vcmp.eq.s32.totalorder %v1822_v21, 5  ;;  %vm1111_vm10 = vcmp.eq.s32.totalorder %v1819_v19, 6  ;;  %vm1112_vm11 = vcmp.eq.s32.totalorder %v1822_v21, 6 }
  0x6e   : > { %2895 = vst [vmem:[#allocation15_spill] sm:$0xff] %v1992_v63  ;;  %vm333_vm12 = vcmp.eq.s32.totalorder %v1853_v40, 1  ;;  %vm334_vm13 = vcmp.eq.s32.totalorder %v1856_v41, 1  ;;  %vm335_vm14 = vcmp.eq.s32.totalorder %v1861_v43, 1  ;;  %vm336_vm15 = vcmp.eq.s32.totalorder %v1867_v47, 1 }
  0x6f   : > { %vm337_vm0 = vcmp.eq.s32.totalorder %v1870_v48, 1  ;;  %vm338_vm1 = vcmp.eq.s32.totalorder %v1875_v50, 1  ;;  %vm339_vm2 = vcmp.eq.s32.totalorder %v1881_v54, 1  ;;  %vm340_vm3 = vcmp.eq.s32.totalorder %v1884_v55, 1 }
  0x70   : > { %vm691_vm4 = vcmp.eq.s32.totalorder %v1888_v57, 1  ;;  %vm692_vm5 = vcmp.eq.s32.totalorder %v1891_v58, 1 }
  0x71   : > { %1458 = vset.pattern.permute.xlu1 %v1602_v7  ;;  %1462 = vset.pattern.permute.xlu0 %v1603_v8 }
  0x72   : > { %988 = vperm.xlu1 %1458, %v258_v1   ;;  %1092 = vperm.xlu0 %1462, %v259_v3  }
  0x76   : > { %1460 = vset.pattern.permute.xlu1 %v1601_v6  ;;  %1465 = vset.pattern.permute.xlu0 %v1604_v9  ;;  %v742_v6 = vrot.slane %v356_v61, %v1835_v27 }
  0x77   : > { %518 = vperm.xlu1 %1460, %v257_v2   ;;  %1192 = vperm.xlu0 %1465, %v259_v3   ;;  %v730_v3 = vrot.slane %v355_v53, %v1839_v30  ;;  %v834_v53 = vrot.slane %v1923_v11, %v1845_v34 }
  0x78   : > { %v1946_v29 = vrot.slane %v742_v6, %v1835_v27  ;;  %v846_v6 = vrot.slane %v1926_v12, %v1843_v33 }
  0x79   : > { %v1935_v17 = vrot.slane %v730_v3, %v1835_v27  ;;  %v1995_v3 = vrot.slane %v388_v37, %v1824_v22  ;;  %v2029_v37 = vrot.slane %v838_v4, %v1835_v27 }
  0x7b   : > { %1461 = vset.pattern.permute.xlu1 %v1603_v8  ;;  %v750_v8 = vrot.slane %v356_v61, %v1843_v33  ;;  %2896 = vst [vmem:[#allocation16_spill] sm:$0xff] %v1995_v3  ;;  %2899 = vst [vmem:[#allocation19_spill] sm:$0xff] %v2029_v37 }
  0x7c   : > { %1088 = vperm.xlu1 %1461, %v258_v1  }
  0x7d   : > { %v1952_v32 = vrot.slane %v750_v8, %v1835_v27  ;;  %v2006_v8 = vsel %vm530_vm7, 1, %v2825_v0  ;;  %vm694_vm7 = vcmp.eq.s32.totalorder %v1897_v60, 1 }
  0x7e   : > { %v934_v49 = vrot.slane %v2006_v8, %v1835_v27  ;;  %v946_v3 = vrot.slane %v2006_v8, %v1845_v34 }
  0x80   : > { %1463 = vset.pattern.permute.xlu1 %v1602_v7  ;;  %v746_v7 = vrot.slane %v356_v61, %v1839_v30  ;;  %v1989_v61 = vrot.slane %v380_v35, %v1824_v22  ;;  %v2024_v35 = vrot.slane %v834_v53, %v1835_v27  ;;  %v2041_v53 = vrot.slane %v846_v6, %v1835_v27 }
  0x81   : > { %606 = vperm.xlu1 %1463, %v257_v2   ;;  %v1910_v2 = vrot.slane %v654_v52, %v1835_v27  ;;  %v830_v52 = vrot.slane %v1923_v11, %v1843_v33 }
  0x82   : > { %v1949_v31 = vrot.slane %v746_v7, %v1835_v27  ;;  %2894 = vst [vmem:[#allocation14_spill] sm:$0xff] %v1989_v61  ;;  %v850_v7 = vrot.slane %v1926_v12, %v1845_v34  ;;  %2898 = vst [vmem:[#allocation18_spill] sm:$0xff] %v2024_v35 }
  0x83   : > { %v2021_v26 = vrot.slane %v830_v52, %v1835_v27  ;;  %v2038_v52 = vrot.slane %v842_v5, %v1835_v27  ;;  %2901 = vst [vmem:[#allocation21_spill] sm:$0xff] %v2041_v53 }
  0x84   : > { %v2047_v4 = vrot.slane %v850_v7, %v1835_v27  ;;  %v448_v7 = vrot.slane %v1923_v11, %v1824_v22 }
  0x85   : > { %1464 = vset.pattern.permute.xlu1 %v1604_v9  ;;  %v1919_v9 = vrot.slane %v658_v56, %v1835_v27  ;;  %v1986_v56 = vsel %vm529_vm6, 1, %v2825_v0  ;;  %2897 = vst [vmem:[#allocation17_spill] sm:$0xff] %v2021_v26  ;;  %v938_v0 = vrot.slane %v2006_v8, %v1839_v30  ;;  %2900 = vst [vmem:[#allocation20_spill] sm:$0xff] %v2038_v52  ;;  %vm693_vm6 = vcmp.eq.s32.totalorder %v1894_v59, 1 }
  0x86   : > { %1188 = vperm.xlu1 %1464, %v258_v1   ;;  %v1907_v1 = vrot.slane %v650_v51, %v1835_v27  ;;  %v826_v51 = vrot.slane %v1923_v11, %v1839_v30  ;;  %v918_v14 = vrot.slane %v1986_v56, %v1835_v27  ;;  %v922_v15 = vrot.slane %v1986_v56, %v1839_v30 }
  0x87   : > { %v926_v16 = vrot.slane %v1986_v56, %v1843_v33  ;;  %v930_v36 = vrot.slane %v1986_v56, %v1845_v34  ;;  %2902 = vst [vmem:[#allocation22_spill] sm:$0xff] %v2047_v4  ;;  %v460_v4 = vrot.slane %v1923_v11, %v1831_v25 }
  0x88   : > { %v2018_v20 = vrot.slane %v826_v51, %v1835_v27  ;;  %v942_v51 = vrot.slane %v2006_v8, %v1843_v33  ;;  %v2050_v63 = vrot.slane %v918_v14, %v1835_v27  ;;  %v2053_v61 = vrot.slane %v922_v15, %v1835_v27 }
  0x89   : > { %v2056_v5 = vrot.slane %v926_v16, %v1835_v27  ;;  %v2063_v53 = vrot.slane %v930_v36, %v1835_v27  ;;  %v452_v14 = vrot.slane %v1923_v11, %v1826_v23  ;;  %v2071_v15 = vrot.slane %v934_v49, %v1835_v27  ;;  %v2941_v50 = vld [vmem:[#allocation18_spill] sm:$0xff] }
  0x8a   : > { %2903 = vst [vmem:[#allocation23_spill] sm:$0xff] %v2050_v63  ;;  %2904 = vst [vmem:[#allocation24_spill] sm:$0xff] %v2053_v61  ;;  %v2074_v16 = vrot.slane %v938_v0, %v1835_v27  ;;  %v2911_v61 = vmov 0   ;;  %v456_v63 = vrot.slane %v1923_v11, %v1829_v24  ;;  %v464_v49 = vrot.slane %v1926_v12, %v1824_v22 }
  0x8b   : > { %2905 = vst [vmem:[#allocation25_spill] sm:$0xff] %v2056_v5  ;;  %2907 = vst [vmem:[#allocation27_spill] sm:$0xff] %v2063_v53  ;;  %v2077_v5 = vrot.slane %v942_v51, %v1835_v27  ;;  %v1013_v36 = vsel %vm1011_vm8, 1, %v2911_v61  ;;  %v2081_v53 = vrot.slane %v946_v3, %v1835_v27  ;;  %v468_v0 = vrot.slane %v1926_v12, %v1826_v23 }
  0x8c   : > { %2908 = vst [vmem:[#allocation28_spill] sm:$0xff] %v2071_v15  ;;  %2909 = vst [vmem:[#allocation29_spill] sm:$0xff] %v2074_v16  ;;  %v472_v51 = vrot.slane %v1926_v12, %v1829_v24  ;;  %v1014_v3 = vsel %vm1012_vm9, 1, %v2911_v61  ;;  %v2099_v16 = vrot.slane %v448_v7, %v1824_v22  ;;  %v2102_v11 = vrot.slane %v452_v14, %v1824_v22  ;;  %v2940_v48 = vld [vmem:[#allocation17_spill] sm:$0xff] }
  0x8d   : > { %2910 = vst [vmem:[#allocation30_spill] sm:$0xff] %v2077_v5  ;;  %2912 = vst [vmem:[#allocation31_spill] sm:$0xff] %v2081_v53  ;;  %v476_v5 = vrot.slane %v1926_v12, %v1831_v25  ;;  %v1018_v15 = vrot.slane %v1013_v36, %v1835_v27  ;;  %v1022_v37 = vrot.slane %v1013_v36, %v1839_v30  ;;  %vm792_vm9 = vcmp.eq.s32.totalorder %v1949_v31, 1 }
  0x8e   : > { %2914 = vst [vmem:[#allocation33_spill] sm:$0xff] %v2099_v16  ;;  %2915 = vst [vmem:[#allocation34_spill] sm:$0xff] %v2102_v11  ;;  %v1026_v12 = vrot.slane %v1013_v36, %v1843_v33  ;;  %v1034_v7 = vrot.slane %v1014_v3, %v1835_v27  ;;  %v1038_v16 = vrot.slane %v1014_v3, %v1839_v30  ;;  %vm793_vm8 = vcmp.eq.s32.totalorder %v1952_v32, 1 }
  0x8f   : > { %v1042_v14 = vrot.slane %v1014_v3, %v1843_v33  ;;  %v1046_v11 = vrot.slane %v1014_v3, %v1845_v34  ;;  %v2120_v35 = vrot.slane %v460_v4, %v1824_v22  ;;  %v2123_v26 = vrot.slane %v464_v49, %v1824_v22 }
  0x90   : > { %v2136_v4 = vrot.slane %v476_v5, %v1824_v22  ;;  %v2139_v49 = vrot.slane %v1018_v15, %v1835_v27  ;;  %v2153_v5 = vrot.slane %v1022_v37, %v1835_v27  ;;  %v2156_v15 = vrot.slane %v1026_v12, %v1835_v27 }
  0x91   : > { %2917 = vst [vmem:[#allocation36_spill] sm:$0xff] %v2120_v35  ;;  %2918 = vst [vmem:[#allocation37_spill] sm:$0xff] %v2123_v26  ;;  %v2169_v37 = vrot.slane %v1034_v7, %v1835_v27  ;;  %v2172_v12 = vrot.slane %v1038_v16, %v1835_v27  ;;  %v2178_v21 = vrot.slane %v1046_v11, %v1835_v27 }
  0x92   : > { %2921 = vst [vmem:[#allocation40_spill] sm:$0xff] %v2136_v4  ;;  %2922 = vst [vmem:[#allocation41_spill] sm:$0xff] %v2156_v15  ;;  %v1114_v4 = vsel %vm1112_vm11, 1, %v2911_v61  ;;  %v536_v35 = vrot.slane %v1986_v56, %v1824_v22 }
  0x93   : > { %2925 = vst [vmem:[#allocation44_spill] sm:$0xff] %v2178_v21  ;;  %v1138_v11 = vrot.slane %v1114_v4, %v1839_v30  ;;  %v1146_v26 = vrot.slane %v1114_v4, %v1845_v34  ;;  %v544_v21 = vrot.slane %v1986_v56, %v1829_v24 }
  0xd1   : > { %v2058_v46 = vpop.permute.xlu1 %619  ;;  %v2060_v6 = vpop.permute.xlu0 %262 }
  0xd2   : > { %2906 = vst [vmem:[#allocation26_spill] sm:$0xff] %v2058_v46  ;;  %v1030_v46 = vrot.slane %v1013_v36, %v1845_v34  ;;  %v2126_v36 = vrot.slane %v468_v0, %v1824_v22  ;;  %v1113_v0 = vsel %vm1111_vm10, 1, %v2911_v61  ;;  %vm791_vm10 = vcmp.eq.s32.totalorder %v1946_v29, 1 }
  0xd3   : > { %v1118_v61 = vrot.slane %v1113_v0, %v1835_v27  ;;  %v1122_v7 = vrot.slane %v1113_v0, %v1839_v30  ;;  %v1126_v16 = vrot.slane %v1113_v0, %v1843_v33 }
  0xd4   : > { %2919 = vst [vmem:[#allocation38_spill] sm:$0xff] %v2126_v36  ;;  %v2159_v19 = vrot.slane %v1030_v46, %v1835_v27  ;;  %v2175_v46 = vrot.slane %v1042_v14, %v1835_v27  ;;  %v1130_v14 = vrot.slane %v1113_v0, %v1845_v34  ;;  %v1142_v36 = vrot.slane %v1114_v4, %v1843_v33 }
  0xd5   : > { %v2096_v53 = vpop.permute.xlu1 %624  ;;  %v548_v0 = vrot.slane %v1986_v56, %v1831_v25  ;;  %v552_v33 = vrot.slane %v2006_v8, %v1824_v22  ;;  %v556_v34 = vrot.slane %v2006_v8, %v1826_v23  ;;  %v2224_v28 = vrot.slane %v1122_v7, %v1835_v27 }
  0xd6   : > { %2913 = vst [vmem:[#allocation32_spill] sm:$0xff] %v2096_v53  ;;  %v2106_v52 = vpop.permute.xlu0 %342  ;;  %v2117_v53 = vrot.slane %v456_v63, %v1824_v22  ;;  %v2133_v63 = vrot.slane %v472_v51, %v1824_v22  ;;  %2923 = vst [vmem:[#allocation42_spill] sm:$0xff] %v2159_v19  ;;  %v2239_v38 = vrot.slane %v1142_v36, %v1835_v27  ;;  %v2965_v19 = vld [vmem:[#allocation44_spill] sm:$0xff] }
  0xd7   : > { %2924 = vst [vmem:[#allocation43_spill] sm:$0xff] %v2175_v46  ;;  %v2245_v7 = vrot.slane %v536_v35, %v1824_v22  ;;  %v2260_v36 = vrot.slane %v556_v34, %v1824_v22  ;;  %v2272_v35 = vsel %vm333_vm12, %v2106_v52, %v2060_v6  ;;  %v2300_v41 = vsel %vm337_vm0, %v2106_v52, %v2060_v6 }
  0xd8   : > { %2916 = vst [vmem:[#allocation35_spill] sm:$0xff] %v2117_v53  ;;  %2920 = vst [vmem:[#allocation39_spill] sm:$0xff] %v2133_v63  ;;  %v1134_v63 = vrot.slane %v1114_v4, %v1835_v27  ;;  %v540_v53 = vrot.slane %v1986_v56, %v1826_v23  ;;  %v560_v56 = vrot.slane %v2006_v8, %v1829_v24  ;;  %vm2951_vm0 = vcmp.eq.s32.totalorder %v1901_v62, 1 }
  0xd9   : > { %v564_v4 = vrot.slane %v2006_v8, %v1831_v25  ;;  %v2227_v23 = vrot.slane %v1126_v16, %v1835_v27  ;;  %v2230_v24 = vrot.slane %v1130_v14, %v1835_v27  ;;  %v2236_v8 = vrot.slane %v1138_v11, %v1835_v27  ;;  %2927 = vst [vmem:[#allocation46_spill] sm:$0xff] %v2245_v7  ;;  %v2942_v54 = vld [vmem:[#allocation26_spill] sm:$0xff] }
  0xda   : > { %v2148_v51 = vpop.permute.xlu1 %700  ;;  %v2150_v3 = vpop.permute.xlu0 %704  ;;  %v2233_v25 = vrot.slane %v1134_v63, %v1835_v27  ;;  %v2248_v16 = vrot.slane %v540_v53, %v1824_v22  ;;  %v2251_v14 = vrot.slane %v544_v21, %v1824_v22  ;;  %v2254_v63 = vrot.slane %v548_v0, %v1824_v22  ;;  %2932 = vst [vmem:[#allocation51_spill] sm:$0xff] %v2260_v36  ;;  %v2957_v7 = vld [vmem:[#allocation30_spill] sm:$0xff] }
  0xdb   : > { %v2257_v11 = vrot.slane %v552_v33, %v1824_v22  ;;  %v2278_v53 = vsel %vm334_vm13, %v2106_v52, %v2060_v6  ;;  %v2284_v21 = vsel %vm335_vm14, %v2106_v52, %v2060_v6  ;;  %2936 = vst [vmem:[#allocation55_spill] sm:$0xff] %v2300_v41  ;;  %v2306_v43 = vsel %vm338_vm1, %v2106_v52, %v2060_v6 }
  0xdc   : > { %2928 = vst [vmem:[#allocation47_spill] sm:$0xff] %v2248_v16  ;;  %2929 = vst [vmem:[#allocation48_spill] sm:$0xff] %v2251_v14  ;;  %v2312_v47 = vsel %vm339_vm2, %v2106_v52, %v2060_v6  ;;  %v2318_v33 = vsel %vm340_vm3, %v2106_v52, %v2060_v6  ;;  %v707_v55 = vsel %vm691_vm4, %v2148_v51, %v2942_v54  ;;  %vm2953_vm12 = vcmp.eq.s32.totalorder %v1910_v2, 1  ;;  %v2955_v14 = vld [vmem:[#allocation28_spill] sm:$0xff]  ;;  %v2956_v16 = vld [vmem:[#allocation29_spill] sm:$0xff] }
  0xdd   : > { %2930 = vst [vmem:[#allocation49_spill] sm:$0xff] %v2254_v63  ;;  %2931 = vst [vmem:[#allocation50_spill] sm:$0xff] %v2257_v11  ;;  %v710_v34 = vsel %vm694_vm7, %v2148_v51, %v2942_v54  ;;  %v713_v11 = vsel %vm2953_vm12, %v2148_v51, %v2942_v54  ;;  %vm2954_vm2 = vcmp.eq.s32.totalorder %v1919_v9, 1  ;;  %vm2875_vm1 = vcmp.eq.s32.totalorder %v2955_v14, 1  ;;  %v2959_v41 = vld [vmem:[#allocation32_spill] sm:$0xff] }
  0xde   : > { %2937 = vst [vmem:[#allocation56_spill] sm:$0xff] %v2306_v43  ;;  %2938 = vst [vmem:[#allocation57_spill] sm:$0xff] %v2312_v47  ;;  %v714_v63 = vsel %vm2954_vm2, %v2148_v51, %v2942_v54  ;;  %vm2876_vm11 = vcmp.eq.s32.totalorder %v2956_v16, 1  ;;  %v715_v43 = vsel %vm691_vm4, %v2150_v3, %v2959_v41  ;;  %v716_v47 = vsel %vm692_vm5, %v2150_v3, %v2959_v41 }
  0xdf   : > { %v2200_v46 = vpop.permute.xlu1 %796  ;;  %v2206_v30 = vpop.permute.xlu0 %800  ;;  %2939 = vst [vmem:[#allocation58_spill] sm:$0xff] %v2318_v33  ;;  %v2946_v33 = vld [vmem:[#allocation22_spill] sm:$0xff]  ;;  %vm2962_vm2 = vmmov %vm2953_vm12 }
  0xe0   : > { %2926 = vst [vmem:[#allocation45_spill] sm:$0xff] %v2206_v30  ;;  %v2221_v30 = vrot.slane %v1118_v61, %v1835_v27  ;;  %v2242_v61 = vrot.slane %v1146_v26, %v1835_v27  ;;  %v2263_v27 = vrot.slane %v560_v56, %v1824_v22  ;;  %v2266_v26 = vrot.slane %v564_v4, %v1824_v22  ;;  %v2943_v56 = vld [vmem:[#allocation19_spill] sm:$0xff]  ;;  %v2944_v4 = vld [vmem:[#allocation20_spill] sm:$0xff] }
  0xe1   : > { %v2290_v22 = vsel %vm336_vm15, %v2106_v52, %v2060_v6  ;;  %v708_v52 = vsel %vm692_vm5, %v2148_v51, %v2942_v54  ;;  %v709_v6 = vsel %vm693_vm6, %v2148_v51, %v2942_v54  ;;  %vm887_vm3 = vcmp.eq.s32.totalorder %v2943_v56, 1  ;;  %v3025_v16 = vld [vmem:[#allocation51_spill] sm:$0xff] }
  0xe2   : > { %2933 = vst [vmem:[#allocation52_spill] sm:$0xff] %v2263_v27  ;;  %2934 = vst [vmem:[#allocation53_spill] sm:$0xff] %v2266_v26  ;;  %v711_v27 = vsel %vm2951_vm0, %v2148_v51, %v2942_v54  ;;  %vm2952_vm15 = vcmp.eq.s32.totalorder %v1907_v1, 1  ;;  %vm2877_vm0 = vcmp.eq.s32.totalorder %v2957_v7, 1  ;;  %v2958_v26 = vld [vmem:[#allocation31_spill] sm:$0xff]  ;;  %v721_v59 = vsel %vm2962_vm2, %v2150_v3, %v2959_v41 }
  0xe3   : > { %v2292_v40 = vpop.permute.xlu0 %430  ;;  %v712_v36 = vsel %vm2952_vm15, %v2148_v51, %v2942_v54  ;;  %vm2878_vm13 = vcmp.eq.s32.totalorder %v2958_v26, 1  ;;  %v717_v51 = vsel %vm693_vm6, %v2150_v3, %v2959_v41  ;;  %v718_v54 = vsel %vm694_vm7, %v2150_v3, %v2959_v41  ;;  %vm2961_vm7 = vmmov %vm2952_vm15 }
  0xe4   : > { %v2294_v0 = vpop.permute.xlu1 %892  ;;  %vm2960_vm6 = vcmp.eq.s32.totalorder %v1901_v62, 1  ;;  %v720_v58 = vsel %vm2961_vm7, %v2150_v3, %v2959_v41  ;;  %vm2963_vm15 = vcmp.eq.s32.totalorder %v1919_v9, 1  ;;  %v2964_v62 = vld [vmem:[#allocation43_spill] sm:$0xff]  ;;  %vm2966_vm7 = vcmp.eq.s32.totalorder %v1929_v13, 1  ;;  %v2984_v13 = vld [vmem:[#allocation16_spill] sm:$0xff] }
  0xe5   : > { %2935 = vst [vmem:[#allocation54_spill] sm:$0xff] %v2294_v0  ;;  %v2945_v0 = vld [vmem:[#allocation21_spill] sm:$0xff]  ;;  %v719_v57 = vsel %vm2960_vm6, %v2150_v3, %v2959_v41  ;;  %v722_v60 = vsel %vm2963_vm15, %v2150_v3, %v2959_v41  ;;  %v2417_v1 = vsel %vm2966_vm7, %v2200_v46, %v707_v55  ;;  %vm2967_vm2 = vcmp.eq.s32.totalorder %v1935_v17, 1  ;;  %v2969_v3 = vld [vmem:[#allocation11_spill] sm:$0xff] }
  0xe6   : > { %vm2873_vm14 = vcmp.eq.s32.totalorder %v2945_v0, 1  ;;  %v2422_v2 = vsel %vm2967_vm2, %v2200_v46, %v708_v52  ;;  %vm2968_vm15 = vcmp.eq.s32.totalorder %v1938_v18, 1  ;;  %vm2970_vm6 = vcmp.eq.s32.totalorder %v2969_v3, 1  ;;  %vm2978_vm4 = vmmov %vm2967_vm2 }
  0xe7   : > { %v2427_v9 = vsel %vm2968_vm15, %v2200_v46, %v709_v6  ;;  %v2432_v41 = vsel %vm2970_vm6, %v2200_v46, %v710_v34  ;;  %v2441_v55 = vsel %vm791_vm10, %v2200_v46, %v711_v27  ;;  %v2446_v52 = vsel %vm792_vm9, %v2200_v46, %v712_v36  ;;  %v2974_v34 = vld [vmem:[#allocation12_spill] sm:$0xff]  ;;  %v2977_v36 = vld [vmem:[#allocation45_spill] sm:$0xff] }
  0xe8   : > { %v897_v26 = vpop.permute.xlu1 %896  ;;  %v2388_v7 = vpop.permute.xlu0 %992  ;;  %2971 = vst [vmem:[#allocation17_spill] sm:$0xff] %v2432_v41  ;;  %2972 = vst [vmem:[#allocation18_spill] sm:$0xff] %v2446_v52  ;;  %v2451_v6 = vsel %vm793_vm8, %v2200_v46, %v713_v11  ;;  %vm2975_vm6 = vcmp.eq.s32.totalorder %v2974_v34, 1  ;;  %v811_v27 = vsel %vm2966_vm7, %v2977_v36, %v715_v43  ;;  %v812_v11 = vsel %vm2978_vm4, %v2977_v36, %v716_v47  ;;  %v2983_v52 = vld [vmem:[#allocation15_spill] sm:$0xff] }
  0xe9   : > { %2973 = vst [vmem:[#allocation26_spill] sm:$0xff] %v2451_v6  ;;  %v2456_v41 = vsel %vm2975_vm6, %v2200_v46, %v714_v63  ;;  %vm2979_vm6 = vmmov %vm2968_vm15  ;;  %vm2980_vm2 = vcmp.eq.s32.totalorder %v2969_v3, 1  ;;  %v2982_v6 = vld [vmem:[#allocation14_spill] sm:$0xff]  ;;  %vm427_vm15 = vcmp.eq.s32.totalorder %v2983_v52, 1  ;;  %vm428_vm7 = vcmp.eq.s32.totalorder %v2984_v13, 1  ;;  %v3026_v14 = vld [vmem:[#allocation52_spill] sm:$0xff] }
  0xea   : > { %2976 = vst [vmem:[#allocation19_spill] sm:$0xff] %v2456_v41  ;;  %v813_v46 = vsel %vm2979_vm6, %v2977_v36, %v717_v51  ;;  %v814_v63 = vsel %vm2980_vm2, %v2977_v36, %v718_v54  ;;  %v2981_v41 = vld [vmem:[#allocation13_spill] sm:$0xff]  ;;  %vm426_vm12 = vcmp.eq.s32.totalorder %v2982_v6, 1  ;;  %v815_v17 = vsel %vm791_vm10, %v2977_v36, %v719_v57 }
  0xeb   : > { %vm425_vm5 = vcmp.eq.s32.totalorder %v2981_v41, 1  ;;  %v816_v18 = vsel %vm792_vm9, %v2977_v36, %v720_v58  ;;  %v817_v43 = vsel %vm793_vm8, %v2977_v36, %v721_v59  ;;  %vm2985_vm4 = vcmp.eq.s32.totalorder %v2974_v34, 1 }
  0xec   : > { %v818_v47 = vsel %vm2985_vm4, %v2977_v36, %v722_v60  ;;  %vm2986_vm2 = vcmp.eq.s32.totalorder %v2009_v10, 1  ;;  %vm2987_vm10 = vcmp.eq.s32.totalorder %v2018_v20, 1  ;;  %vm2988_vm6 = vcmp.eq.s32.totalorder %v2940_v48, 1 }
  0xed   : > { %v2490_v51 = vpop.permute.xlu1 %988  ;;  %v1093_v54 = vpop.permute.xlu0 %1092  ;;  %v907_v3 = vsel %vm2986_vm2, %v897_v26, %v811_v27  ;;  %v908_v29 = vsel %vm2987_vm10, %v897_v26, %v812_v11  ;;  %v909_v31 = vsel %vm2988_vm6, %v897_v26, %v813_v46  ;;  %vm2989_vm9 = vcmp.eq.s32.totalorder %v2941_v50, 1  ;;  %v3015_v11 = vld [vmem:[#allocation46_spill] sm:$0xff] }
  0xee   : > { %v910_v32 = vsel %vm2989_vm9, %v897_v26, %v814_v63  ;;  %v911_v57 = vsel %vm887_vm3, %v897_v26, %v815_v17  ;;  %vm2990_vm8 = vcmp.eq.s32.totalorder %v2944_v4, 1  ;;  %v913_v59 = vsel %vm2873_vm14, %v897_v26, %v817_v43  ;;  %v3007_v63 = vld [vmem:[#allocation27_spill] sm:$0xff]  ;;  %v3010_v43 = vld [vmem:[#allocation38_spill] sm:$0xff] }
  0xef   : > { %v912_v58 = vsel %vm2990_vm8, %v897_v26, %v816_v18  ;;  %vm2991_vm4 = vcmp.eq.s32.totalorder %v2946_v33, 1  ;;  %vm2992_vm2 = vcmp.eq.s32.totalorder %v1962_v39, 1  ;;  %vm2993_vm10 = vcmp.eq.s32.totalorder %v1965_v42, 1  ;;  %v2997_v39 = vld [vmem:[#allocation33_spill] sm:$0xff]  ;;  %v3016_v42 = vld [vmem:[#allocation47_spill] sm:$0xff] }
  0xf0   : > { %v914_v60 = vsel %vm2991_vm4, %v897_v26, %v818_v47  ;;  %v2512_v34 = vsel %vm2992_vm2, %v2292_v40, %v2272_v35  ;;  %v2518_v36 = vsel %vm2993_vm10, %v2292_v40, %v2278_v53  ;;  %vm2994_vm6 = vcmp.eq.s32.totalorder %v1968_v44, 1  ;;  %v2998_v35 = vld [vmem:[#allocation34_spill] sm:$0xff]  ;;  %v3001_v53 = vld [vmem:[#allocation23_spill] sm:$0xff]  ;;  %v3009_v18 = vld [vmem:[#allocation37_spill] sm:$0xff] }
  0xf1   : > { %v2524_v27 = vsel %vm2994_vm6, %v2292_v40, %v2284_v21  ;;  %vm2995_vm9 = vcmp.eq.s32.totalorder %v1971_v45, 1  ;;  %vm3002_vm14 = vcmp.eq.s32.totalorder %v3001_v53, 1  ;;  %v3003_v21 = vld [vmem:[#allocation24_spill] sm:$0xff]  ;;  %v3005_v45 = vld [vmem:[#allocation25_spill] sm:$0xff]  ;;  %vm3008_vm8 = vcmp.eq.s32.totalorder %v3007_v63, 1  ;;  %v3011_v47 = vld [vmem:[#allocation39_spill] sm:$0xff] }
  0xf2   : > { %v2530_v26 = vsel %vm2995_vm9, %v2292_v40, %v2290_v22  ;;  %v1003_v44 = vsel %vm3002_vm14, %v2388_v7, %v907_v3  ;;  %vm3004_vm6 = vcmp.eq.s32.totalorder %v3003_v21, 1  ;;  %vm3006_vm9 = vcmp.eq.s32.totalorder %v3005_v45, 1  ;;  %v3048_v13 = vld [vmem:[#allocation17_spill] sm:$0xff] }
  0xf3   : > { %2996 = vst [vmem:[#allocation20_spill] sm:$0xff] %v2530_v26  ;;  %v1004_v46 = vsel %vm3004_vm6, %v2388_v7, %v908_v29  ;;  %v1005_v22 = vsel %vm3006_vm9, %v2388_v7, %v909_v31  ;;  %v1006_v17 = vsel %vm3008_vm8, %v2388_v7, %v910_v32  ;;  %vm513_vm2 = vcmp.eq.s32.totalorder %v3009_v18, 1  ;;  %v519_v26 = vpop.permute.xlu1 %518  ;;  %v3024_v31 = vld [vmem:[#allocation50_spill] sm:$0xff] }
  0xf4   : > { %vm514_vm10 = vcmp.eq.s32.totalorder %v3010_v43, 1  ;;  %vm515_vm4 = vcmp.eq.s32.totalorder %v3011_v47, 1  ;;  %v1007_v3 = vsel %vm2875_vm1, %v2388_v7, %v911_v57  ;;  %v1008_v29 = vsel %vm2876_vm11, %v2388_v7, %v912_v58  ;;  %v1193_v47 = vpop.permute.xlu0 %1192  ;;  %v3027_v57 = vld [vmem:[#allocation53_spill] sm:$0xff] }
  0xf5   : > { %v1009_v32 = vsel %vm2877_vm0, %v2388_v7, %v913_v59  ;;  %v1010_v43 = vsel %vm2878_vm13, %v2388_v7, %v914_v60  ;;  %vm3019_vm11 = vcmp.eq.s32.totalorder %v2139_v49, 1  ;;  %vm3020_vm14 = vcmp.eq.s32.totalorder %v2153_v5, 1  ;;  %v3022_v7 = vld [vmem:[#allocation42_spill] sm:$0xff] }
  0xf6   : > { %v1103_v58 = vsel %vm3019_vm11, %v1093_v54, %v1003_v44  ;;  %v1104_v59 = vsel %vm3020_vm14, %v1093_v54, %v1004_v46  ;;  %vm3021_vm0 = vcmp.eq.s32.totalorder %v2156_v15, 1  ;;  %vm3023_vm13 = vcmp.eq.s32.totalorder %v3022_v7, 1 }
  0xf7   : > { %v1105_v18 = vsel %vm3021_vm0, %v1093_v54, %v1005_v22  ;;  %v1106_v60 = vsel %vm3023_vm13, %v1093_v54, %v1006_v17  ;;  %vm601_vm8 = vcmp.eq.s32.totalorder %v3024_v31, 1  ;;  %vm3028_vm9 = vcmp.eq.s32.totalorder %v2169_v37, 1  ;;  %v1089_v41 = vpop.permute.xlu1 %1088 }
  0xf8   : > { %v1107_v44 = vsel %vm3028_vm9, %v1093_v54, %v1007_v3  ;;  %vm3029_vm0 = vcmp.eq.s32.totalorder %v2172_v12, 1  ;;  %vm3030_vm13 = vcmp.eq.s32.totalorder %v2964_v62, 1  ;;  %vm3031_vm14 = vcmp.eq.s32.totalorder %v2965_v19, 1 }
  0xf9   : > { %v1108_v46 = vsel %vm3029_vm0, %v1093_v54, %v1008_v29  ;;  %v1109_v22 = vsel %vm3030_vm13, %v1093_v54, %v1009_v32  ;;  %v1110_v17 = vsel %vm3031_vm14, %v1093_v54, %v1010_v43  ;;  %vm3032_vm6 = vcmp.eq.s32.totalorder %v2221_v30, 1 }
  0xfa   : > { %v1203_v7 = vsel %vm3032_vm6, %v1193_v47, %v1103_v58  ;;  %vm3033_vm1 = vcmp.eq.s32.totalorder %v2224_v28, 1  ;;  %vm3034_vm11 = vcmp.eq.s32.totalorder %v2227_v23, 1  ;;  %vm3035_vm9 = vcmp.eq.s32.totalorder %v2230_v24, 1 }
  0xfb   : > { %v1204_v15 = vsel %vm3033_vm1, %v1193_v47, %v1104_v59  ;;  %v1205_v3 = vsel %vm3034_vm11, %v1193_v47, %v1105_v18  ;;  %v1206_v29 = vsel %vm3035_vm9, %v1193_v47, %v1106_v60  ;;  %vm3036_vm0 = vcmp.eq.s32.totalorder %v2233_v25, 1  ;;  %1243 = vst [vmem:[%s1808_s29 + $0x80] sm:$0xff] %v1203_v7  ;;  %v3040_v18 = vld [vmem:[#allocation55_spill] sm:$0xff]  ;;  %v3041_v60 = vld [vmem:[#allocation56_spill] sm:$0xff]  ;;  %v3044_v7 = vld [vmem:[#allocation54_spill] sm:$0xff] }
  0xfc   : > { %v1207_v32 = vsel %vm3036_vm0, %v1193_v47, %v1107_v44  ;;  %vm3037_vm13 = vcmp.eq.s32.totalorder %v2236_v8, 1  ;;  %vm3038_vm6 = vcmp.eq.s32.totalorder %v2239_v38, 1  ;;  %vm3039_vm1 = vcmp.eq.s32.totalorder %v2242_v61, 1  ;;  %1244 = vst [vmem:[%s1808_s29 + $0x88] sm:$0xff] %v1204_v15  ;;  %1245 = vst [vmem:[%s1808_s29 + $0x90] sm:$0xff] %v1205_v3 }
  0xfd   : > { %v1208_v54 = vsel %vm3037_vm13, %v1193_v47, %v1108_v46  ;;  %v1209_v43 = vsel %vm3038_vm6, %v1193_v47, %v1109_v22  ;;  %v1210_v58 = vsel %vm3039_vm1, %v1193_v47, %v1110_v17  ;;  %1246 = vst [vmem:[%s1808_s29 + $0x98] sm:$0xff] %v1206_v29  ;;  %v437_v59 = vsel %vm425_vm5, %v2292_v40, %v3040_v18  ;;  %v3042_v46 = vld [vmem:[#allocation57_spill] sm:$0xff]  ;;  %v3043_v47 = vld [vmem:[#allocation58_spill] sm:$0xff]  ;;  %v3064_v29 = vld [vmem:[#allocation20_spill] sm:$0xff] }
  0xfe   : > { %v438_v44 = vsel %vm426_vm12, %v2292_v40, %v3041_v60  ;;  %v439_v22 = vsel %vm427_vm15, %v2292_v40, %v3042_v46  ;;  %v440_v15 = vsel %vm428_vm7, %v2292_v40, %v3043_v47  ;;  %1247 = vst [vmem:[%s1808_s29 + $0xa0] sm:$0xff] %v1207_v32  ;;  %1248 = vst [vmem:[%s1808_s29 + $0xa8] sm:$0xff] %v1208_v54  ;;  %vm3045_vm5 = vcmp.eq.s32.totalorder %v2009_v10, 1  ;;  %v3076_v47 = vld [vmem:[#allocation49_spill] sm:$0xff] }
  0xff   : > { %1249 = vst [vmem:[%s1808_s29 + $0xb0] sm:$0xff] %v1209_v43  ;;  %1250 = vst [vmem:[%s1808_s29 + $0xb8] sm:$0xff] %v1210_v58  ;;  %v899_v6 = vsel %vm3045_vm5, %v3044_v7, %v2417_v1  ;;  %vm3046_vm12 = vcmp.eq.s32.totalorder %v2018_v20, 1  ;;  %vm3047_vm15 = vcmp.eq.s32.totalorder %v2940_v48, 1  ;;  %vm3049_vm7 = vcmp.eq.s32.totalorder %v2941_v50, 1  ;;  %v3050_v1 = vld [vmem:[#allocation18_spill] sm:$0xff]  ;;  %v607_v58 = vpop.permute.xlu1 %606 }
 0x100   : > { %v900_v52 = vsel %vm3046_vm12, %v3044_v7, %v2422_v2  ;;  %v901_v40 = vsel %vm3047_vm15, %v3044_v7, %v2427_v9  ;;  %v902_v17 = vsel %vm3049_vm7, %v3044_v7, %v3048_v13  ;;  %v903_v10 = vsel %vm887_vm3, %v3044_v7, %v2441_v55  ;;  %v3052_v2 = vld [vmem:[#allocation26_spill] sm:$0xff]  ;;  %v3054_v9 = vld [vmem:[#allocation19_spill] sm:$0xff] }
 0x101   : > { %vm3051_vm11 = vcmp.eq.s32.totalorder %v2944_v4, 1  ;;  %vm3053_vm14 = vcmp.eq.s32.totalorder %v2945_v0, 1  ;;  %vm3055_vm9 = vcmp.eq.s32.totalorder %v2946_v33, 1  ;;  %vm3056_vm0 = vcmp.eq.s32.totalorder %v3001_v53, 1 }
 0x102   : > { %v904_v20 = vsel %vm3051_vm11, %v3044_v7, %v3050_v1  ;;  %v905_v48 = vsel %vm3053_vm14, %v3044_v7, %v3052_v2  ;;  %v906_v50 = vsel %vm3055_vm9, %v3044_v7, %v3054_v9  ;;  %v995_v56 = vsel %vm3056_vm0, %v2490_v51, %v899_v6  ;;  %v3083_v7 = vld [vmem:[#allocation29_spill] sm:$0xff]  ;;  %v3085_v6 = vld [vmem:[#allocation30_spill] sm:$0xff] }
 0x103   : > { %vm3057_vm3 = vcmp.eq.s32.totalorder %v3003_v21, 1  ;;  %vm3058_vm13 = vcmp.eq.s32.totalorder %v3005_v45, 1  ;;  %vm3059_vm6 = vcmp.eq.s32.totalorder %v3007_v63, 1  ;;  %vm3060_vm1 = vcmp.eq.s32.totalorder %v2997_v39, 1  ;;  %v3062_v21 = vld [vmem:[#allocation35_spill] sm:$0xff]  ;;  %v3065_v45 = vld [vmem:[#allocation36_spill] sm:$0xff] }
 0x104   : > { %v996_v55 = vsel %vm3057_vm3, %v2490_v51, %v900_v52  ;;  %v997_v4 = vsel %vm3058_vm13, %v2490_v51, %v901_v40  ;;  %v998_v0 = vsel %vm3059_vm6, %v2490_v51, %v902_v17  ;;  %v521_v33 = vsel %vm3060_vm1, %v519_v26, %v2512_v34  ;;  %v3091_v17 = vld [vmem:[#allocation41_spill] sm:$0xff]  ;;  %v3093_v1 = vld [vmem:[#allocation42_spill] sm:$0xff] }
 0x105   : > { %vm3061_vm5 = vcmp.eq.s32.totalorder %v2998_v35, 1  ;;  %vm3063_vm12 = vcmp.eq.s32.totalorder %v3062_v21, 1  ;;  %vm3066_vm15 = vcmp.eq.s32.totalorder %v3065_v45, 1  ;;  %v525_v63 = vsel %vm513_vm2, %v519_v26, %v437_v59  ;;  %v3070_v35 = vld [vmem:[#allocation40_spill] sm:$0xff] }
 0x106   : > { %v522_v53 = vsel %vm3061_vm5, %v519_v26, %v2518_v36  ;;  %v523_v3 = vsel %vm3063_vm12, %v519_v26, %v2524_v27  ;;  %v524_v32 = vsel %vm3066_vm15, %v519_v26, %v3064_v29  ;;  %v526_v34 = vsel %vm514_vm10, %v519_v26, %v438_v44  ;;  %v3074_v59 = vld [vmem:[#allocation48_spill] sm:$0xff] }
 0x107   : > { %v527_v36 = vsel %vm515_vm4, %v519_v26, %v439_v22  ;;  %vm3071_vm7 = vcmp.eq.s32.totalorder %v3070_v35, 1  ;;  %vm3072_vm11 = vcmp.eq.s32.totalorder %v3015_v11, 1  ;;  %vm3073_vm14 = vcmp.eq.s32.totalorder %v3016_v42, 1 }
 0x108   : > { %v528_v27 = vsel %vm3071_vm7, %v519_v26, %v440_v15  ;;  %v609_v18 = vsel %vm3072_vm11, %v607_v58, %v521_v33  ;;  %v610_v60 = vsel %vm3073_vm14, %v607_v58, %v522_v53  ;;  %vm3075_vm2 = vcmp.eq.s32.totalorder %v3074_v59, 1  ;;  %v3081_v15 = vld [vmem:[#allocation28_spill] sm:$0xff] }
 0x109   : > { %v611_v46 = vsel %vm3075_vm2, %v607_v58, %v523_v3  ;;  %vm3077_vm10 = vcmp.eq.s32.totalorder %v3076_v47, 1  ;;  %v613_v26 = vsel %vm601_vm8, %v607_v58, %v525_v63  ;;  %vm3078_vm4 = vcmp.eq.s32.totalorder %v3025_v16, 1  ;;  %1227 = vst [vmem:[%s1808_s29] sm:$0xff] %v609_v18  ;;  %1228 = vst [vmem:[%s1808_s29 + $0x8] sm:$0xff] %v610_v60 }
 0x10a   : > { %v612_v44 = vsel %vm3077_vm10, %v607_v58, %v524_v32  ;;  %v614_v11 = vsel %vm3078_vm4, %v607_v58, %v526_v34  ;;  %vm3079_vm9 = vcmp.eq.s32.totalorder %v3026_v14, 1  ;;  %vm3080_vm0 = vcmp.eq.s32.totalorder %v3027_v57, 1  ;;  %1229 = vst [vmem:[%s1808_s29 + $0x10] sm:$0xff] %v611_v46  ;;  %v3087_v57 = vld [vmem:[#allocation31_spill] sm:$0xff]  ;;  %1231 = vst [vmem:[%s1808_s29 + $0x20] sm:$0xff] %v613_v26 }
 0x10b   : > { %v615_v42 = vsel %vm3079_vm9, %v607_v58, %v527_v36  ;;  %v616_v22 = vsel %vm3080_vm0, %v607_v58, %v528_v27  ;;  %1230 = vst [vmem:[%s1808_s29 + $0x18] sm:$0xff] %v612_v44  ;;  %vm3082_vm3 = vcmp.eq.s32.totalorder %v3081_v15, 1  ;;  %vm3084_vm8 = vcmp.eq.s32.totalorder %v3083_v7, 1  ;;  %1232 = vst [vmem:[%s1808_s29 + $0x28] sm:$0xff] %v614_v11 }
 0x10c   : > { %v999_v31 = vsel %vm3082_vm3, %v2490_v51, %v903_v10  ;;  %v1000_v16 = vsel %vm3084_vm8, %v2490_v51, %v904_v20  ;;  %vm3086_vm13 = vcmp.eq.s32.totalorder %v3085_v6, 1  ;;  %vm3088_vm6 = vcmp.eq.s32.totalorder %v3087_v57, 1  ;;  %1233 = vst [vmem:[%s1808_s29 + $0x30] sm:$0xff] %v615_v42  ;;  %1234 = vst [vmem:[%s1808_s29 + $0x38] sm:$0xff] %v616_v22 }
 0x10d   : > { %v1001_v14 = vsel %vm3086_vm13, %v2490_v51, %v905_v48  ;;  %v1002_v52 = vsel %vm3088_vm6, %v2490_v51, %v906_v50  ;;  %vm3089_vm1 = vcmp.eq.s32.totalorder %v2139_v49, 1  ;;  %vm3090_vm5 = vcmp.eq.s32.totalorder %v2153_v5, 1  ;;  %v1189_v51 = vpop.permute.xlu1 %1188 }
 0x10e   : > { %v1095_v40 = vsel %vm3089_vm1, %v1089_v41, %v995_v56  ;;  %v1096_v13 = vsel %vm3090_vm5, %v1089_v41, %v996_v55  ;;  %vm3092_vm12 = vcmp.eq.s32.totalorder %v3091_v17, 1  ;;  %vm3094_vm15 = vcmp.eq.s32.totalorder %v3093_v1, 1 }
 0x10f   : > { %v1097_v10 = vsel %vm3092_vm12, %v1089_v41, %v997_v4  ;;  %v1098_v20 = vsel %vm3094_vm15, %v1089_v41, %v998_v0  ;;  %vm3095_vm7 = vcmp.eq.s32.totalorder %v2169_v37, 1  ;;  %vm3096_vm11 = vcmp.eq.s32.totalorder %v2172_v12, 1 }
 0x110   : > { %v1099_v49 = vsel %vm3095_vm7, %v1089_v41, %v999_v31  ;;  %v1100_v5 = vsel %vm3096_vm11, %v1089_v41, %v1000_v16  ;;  %vm3097_vm14 = vcmp.eq.s32.totalorder %v2964_v62, 1  ;;  %vm3098_vm2 = vcmp.eq.s32.totalorder %v2965_v19, 1 }
 0x111   : > { %v1101_v2 = vsel %vm3097_vm14, %v1089_v41, %v1001_v14  ;;  %v1102_v48 = vsel %vm3098_vm2, %v1089_v41, %v1002_v52  ;;  %vm3099_vm10 = vcmp.eq.s32.totalorder %v2221_v30, 1  ;;  %vm3100_vm4 = vcmp.eq.s32.totalorder %v2224_v28, 1 }
 0x112   : > { %v1195_v37 = vsel %vm3099_vm10, %v1189_v51, %v1095_v40  ;;  %v1196_v12 = vsel %vm3100_vm4, %v1189_v51, %v1096_v13  ;;  %vm3101_vm9 = vcmp.eq.s32.totalorder %v2227_v23, 1  ;;  %vm3102_vm0 = vcmp.eq.s32.totalorder %v2230_v24, 1 }
 0x113   : > { %v1197_v62 = vsel %vm3101_vm9, %v1189_v51, %v1097_v10  ;;  %v1198_v19 = vsel %vm3102_vm0, %v1189_v51, %v1098_v20  ;;  %vm3103_vm3 = vcmp.eq.s32.totalorder %v2233_v25, 1  ;;  %vm3104_vm8 = vcmp.eq.s32.totalorder %v2236_v8, 1  ;;  %1235 = vst [vmem:[%s1808_s29 + $0x40] sm:$0xff] %v1195_v37  ;;  %1236 = vst [vmem:[%s1808_s29 + $0x48] sm:$0xff] %v1196_v12 }
 0x114   : > { %v1199_v41 = vsel %vm3103_vm3, %v1189_v51, %v1099_v49  ;;  %v1200_v30 = vsel %vm3104_vm8, %v1189_v51, %v1100_v5  ;;  %vm3105_vm13 = vcmp.eq.s32.totalorder %v2239_v38, 1  ;;  %vm3106_vm6 = vcmp.eq.s32.totalorder %v2242_v61, 1  ;;  %1237 = vst [vmem:[%s1808_s29 + $0x50] sm:$0xff] %v1197_v62  ;;  %1238 = vst [vmem:[%s1808_s29 + $0x58] sm:$0xff] %v1198_v19 }
 0x115   : > { %v1201_v28 = vsel %vm3105_vm13, %v1189_v51, %v1101_v2  ;;  %v1202_v9 = vsel %vm3106_vm6, %v1189_v51, %v1102_v48  ;;  %1239 = vst [vmem:[%s1808_s29 + $0x60] sm:$0xff] %v1199_v41  ;;  %1240 = vst [vmem:[%s1808_s29 + $0x68] sm:$0xff] %v1200_v30 }
 0x116   : > { %1241 = vst [vmem:[%s1808_s29 + $0x70] sm:$0xff] %v1201_v28  ;;  %1242 = vst [vmem:[%s1808_s29 + $0x78] sm:$0xff] %v1202_v9 }
 0x117   : > { %1539 = shalt.err (!%p1536_p5)
}
 0x118   : > { %s1540_s8 = scalar_lea.hbm %s2741_s12, 4096  ;;  %s1544_s14 = scalar_lea.hbm %s2822_s4, 8192 }
 0x119   : > { %p1541_p9 = scmp.ne.s32.totalorder %s2741_s12, %s1540_s8  ;;  %p1545_p12 = scmp.lt.s32.totalorder %s2741_s12, %s2822_s4 }
 0x11a   : > { %p1546_p1 = scmp.lt.s32.totalorder %s1544_s14, %s1540_s8 }
 0x11b   : > { %p1542_p0 = pnand %p1541_p9, %p3107_p13 }
 0x11c   : > { %p1547_p3 = por %p1546_p1, %p1545_p12 }
 0x11d   : > { %p1543_p11 = pneg %p1542_p0 }
 0x11f   : > { %p1548_p6 = pnand %p1547_p3, %p1543_p11 }
 0x121   : > { %1551 = shalt.err (!%p1548_p6)
}
 0x122   : > { %s1606_s29 = smov 1024   ;;  %s1607_s20 = smov 2048  }
 0x123   : > { %s1608_s19 = smov 64  }
 0x124   : > { %1394 = dma.vmem_to_hbm [thread:$0]  (%p3107_p13), %s2751_s22, 4096, %s2741_s12, %s1260_s5, %s1606_s29, %s1607_s20, %s1608_s19  }
 0x125 PF: > { %s1288_s10 = sand.u32 1, %s1582_s15   ;;  %p3108_p7 = scmp.ne.s32.totalorder %s2884_s28, 0 }
 0x126   : > { %p3109_p8 = scmp.ge.s32.totalorder %s1594_s18, 2  ;;  %s1289_s11 = scalar_lea.sflag [#allocation4], %s1288_s10 }
 0x128   : > { %p1404_p10 = pnand %p3109_p8, %p3108_p7 }
 0x12a   : > { %p1405_p2 = pneg %p1404_p10 }
 0x12c   : > { %1577 = dma.done.wait (%p1405_p2), %s1289_s11, 4096  }
 0x12d   : > { %1579 = vsyncadd (%p1405_p2), %s1289_s11, 4294963200  ;;  %p20_p4 = scmp.ge.s32.totalorder %s1659_s21, 4   ;;  %s3110_s15 = smov %s1586_s16 }
 0x12e   : > { %s3111_s16 = smov %s1590_s17  ;;  %s3112_s17 = smov %s1671_s24 }
 0x12f   : > { %s3113_s18 = smov %s1659_s21  ;;  %22 = sbr.rel (!%p20_p4) target bundleno = 7 (0x7), region = 94 }
 0x134   :  { %1294 = vsyncpa [#allocation3], 1 }
 0x135   :  { %1296 = vsyncpa [#allocation3 + $0x1], 1 }
 0x136   :  { %1297 = vsyncpa [#allocation6], 1 }
 0x137   :  { %1299 = vsyncpa [#allocation6 + $0x1], 1 }
 0x138   :  { %1300 = vsyncpa [#allocation4], 1 }
 0x139   :  { %1302 = vsyncpa [#allocation4 + $0x1], 1 }

</bundles_post_ra>
